<compile_context>
chip_gen: v6e
topology: v6e:2x2x1
jax: 0.10.0
libtpu: 0.0.40
codegen_flags: <defaults>
</compile_context>

<pallas_src>
import functools
import math

import jax
import jax.numpy as jnp
from jax.experimental import pallas as pl
from jax.experimental.pallas import tpu as pltpu


def _round_up(x, n):
    return ((x + n - 1) // n) * n


# ----------------------------------------------------------------------------
# Fused enc1(ReLU) -> enc2(ReLU) -> dec kernel (one group of Bt images / step)
# ----------------------------------------------------------------------------
def _fused_conv3_kernel(wp, marg,
                        x_ref, mask_ref,
                        w1_ref, b1_ref, w2_ref, b2_ref, w3_ref, b3_ref,
                        o_ref):
    """Activations are (C, LBUF_T) bf16 with pixels in the lane dim.  Each of
    the Bt packed images occupies a 640-lane slot [j*LBUF, (j+1)*LBUF) with its
    (H+2)*(W+2) row-major pixels starting at lane j*LBUF + marg; the >=128-lane
    zero margins keep every shifted tap slice in bounds and isolate images.
    A 3x3 tap (dy, dx) is a static lane shift by (dy-1)*wp + (dx-1); the 9
    shifted slices are stacked into a (9*Cin, OUT_LEN) im2col block and the
    layer is ONE bf16 MXU dot (Cout, 9*Cin) @ (9*Cin, OUT_LEN) with f32
    accumulation.  The interior mask re-zeroes ring/margin lanes between layers
    so zero-padding conv semantics are preserved.
    """
    lbuf_t = x_ref.shape[2]
    out_len = lbuf_t - 2 * marg

    def conv_layer(a, w_ref_l, b_ref_l, relu_and_mask):
        # a: (Cin, lbuf_t) bf16
        taps = []
        for dy in range(3):
            for dx in range(3):
                off = (dy - 1) * wp + (dx - 1)                    # |off| <= wp+1
                taps.append(a[:, marg + off: marg + off + out_len])
        patches = jnp.concatenate(taps, axis=0)                   # (9*Cin, N) bf16
        acc = jnp.dot(w_ref_l[...], patches,
                      preferred_element_type=jnp.float32)         # (Cout, N) f32
        acc = acc + b_ref_l[...]                                  # (Cout,1) bcast
        if relu_and_mask:
            acc = jnp.maximum(acc, 0.0) * mask_ref[...]           # f32 epilogue
        return acc

    def repad(h_f32):
        # place the (Cout, OUT_LEN) result back at lane offset `marg` inside a
        # zeroed (Cout, lbuf_t) bf16 buffer for the next layer.
        z = jnp.zeros((h_f32.shape[0], marg), jnp.bfloat16)
        return jnp.concatenate([z, h_f32.astype(jnp.bfloat16), z], axis=1)

    x = x_ref[0]                                                  # (Cin0, lbuf_t) bf16
    h1 = conv_layer(x, w1_ref, b1_ref, True)
    h2 = conv_layer(repad(h1), w2_ref, b2_ref, True)
    out = conv_layer(repad(h2), w3_ref, b3_ref, False)            # (2, OUT_LEN) f32
    o_ref[0] = out.astype(o_ref.dtype)


# ----------------------------------------------------------------------------
# Parameters (encoderALL hidden_number=16; DecoderFlower -> two 1-ch heads)
# ----------------------------------------------------------------------------
def init_params(channel=3, hidden=16, scale=0.05):
    k = jax.random.PRNGKey(0)
    k1, k2, k3, k4, k5, k6 = jax.random.split(k, 6)
    cin0 = 3 * channel  # events_forward + events_backward + img on the C axis
    return {
        "enc_w1": scale * jax.random.normal(k1, (hidden, cin0, 3, 3), jnp.float32),
        "enc_b1": 0.01 * jax.random.normal(k4, (hidden,), jnp.float32),
        "enc_w2": scale * jax.random.normal(k2, (hidden, hidden, 3, 3), jnp.float32),
        "enc_b2": 0.01 * jax.random.normal(k5, (hidden,), jnp.float32),
        # DecoderFlower(dd_in=1): two 1-channel heads fused as one Cout=2 conv.
        "dec_w": scale * jax.random.normal(k3, (2, hidden, 3, 3), jnp.float32),
        "dec_b": 0.01 * jax.random.normal(k6, (2,), jnp.float32),
    }


def _to_stacked(w_oihw):
    # (Cout, Cin, 3, 3) -> (Cout, 9*Cin); column index = (dy*3+dx)*Cin + cin,
    # matching the tap-major im2col stacking inside the kernel.
    cout, cin = w_oihw.shape[0], w_oihw.shape[1]
    return jnp.transpose(w_oihw, (0, 2, 3, 1)).reshape(cout, 9 * cin)


def _vmem_budget(c0p, hidden, lbuf_t, out_len):
    bf2, f4 = 2, 4
    need = (2 * c0p * lbuf_t * bf2                       # double-buffered bf16 input
            + 2 * out_len * f4                           # mask
            + (hidden * 9 * c0p + hidden * 9 * hidden + 2 * 9 * hidden) * bf2
            + (2 * hidden + 2) * f4                      # biases
            + 9 * max(c0p, hidden) * out_len * bf2       # im2col block
            + 2 * hidden * lbuf_t * (bf2 + f4)           # h1/h2 bf16 + f32 acc
            + 2 * 2 * out_len * f4)                      # double-buffered output
    return int(min(64 * 2**20, max(16 * 2**20, 4 * need)))


# ----------------------------------------------------------------------------
# ModelFramePre forward
# ----------------------------------------------------------------------------
def model_frame_pre_forward(params, events_forward, events_backward, img,
                            n_left, n_right):
    """Inputs NCHW float32; n_left/n_right scalar counts.  Returns (S, D) NCHW."""
    B, C, H, W = events_forward.shape
    hidden = params["enc_w1"].shape[0]
    hp, wp = H + 2, W + 2
    lp = hp * wp                       # pixels of the zero-ring-padded grid
    m = wp + 1                         # max |lane shift| of a 3x3 tap
    LP = _round_up(lp, 128)            # lane-dense per-image output width
    MARG = _round_up(max(m, 128), 128)  # zero margin (>= m, 128-aligned)
    LBUF = MARG + LP + MARG            # per-image lane slot (multiple of 128)
    c0p = _round_up(3 * C, 16)         # channels padded to the bf16 sublane tile

    # Pack Bt images per grid step along the lane axis; keep >= 2 grid steps
    # whenever B >= 2 so both v7x TensorCores get work.
    num_groups = 2 if B >= 2 else 1
    Bt = math.ceil(B / num_groups)
    B_pad = num_groups * Bt
    LBUF_T = Bt * LBUF
    OUT_LEN = LBUF_T - 2 * MARG        # multiple of 128

    # TODO(synk): encoderALL's exact use of n_left/n_right is unknown; assumed to
    # normalize the forward/backward event voxels.  Folded into the first conv's
    # weights (linear), so it costs nothing at runtime.
    inv_l = 1.0 / jnp.maximum(jnp.asarray(n_left, jnp.float32), 1.0)
    inv_r = 1.0 / jnp.maximum(jnp.asarray(n_right, jnp.float32), 1.0)
    cin_scale = jnp.concatenate([jnp.full((C,), inv_l, jnp.float32),
                                 jnp.full((C,), inv_r, jnp.float32),
                                 jnp.ones((C,), jnp.float32)])
    w1 = params["enc_w1"] * cin_scale[None, :, None, None]
    w1 = jnp.pad(w1, ((0, 0), (0, c0p - 3 * C), (0, 0), (0, 0)))   # zero channels
    w1k = _to_stacked(w1).astype(jnp.bfloat16)                     # (16, 9*c0p)
    w2k = _to_stacked(params["enc_w2"]).astype(jnp.bfloat16)       # (16, 144)
    w3k = _to_stacked(params["dec_w"]).astype(jnp.bfloat16)        # (2, 144)
    b1 = params["enc_b1"].astype(jnp.float32).reshape(-1, 1)
    b2 = params["enc_b2"].astype(jnp.float32).reshape(-1, 1)
    b3 = params["dec_b"].astype(jnp.float32).reshape(-1, 1)

    # Single fused XLA preprocessing pass: channel concat -> zero channel pad ->
    # zero spatial ring -> flatten pixels -> zero lane margins -> pack Bt images
    # along lanes -> bf16 stream into the kernel.
    x = jnp.concatenate([events_forward, events_backward, img], axis=1)
    x = jnp.pad(x, ((0, 0), (0, c0p - 3 * C), (0, 0), (0, 0)))
    x = jnp.pad(x, ((0, 0), (0, 0), (1, 1), (1, 1))).reshape(B, c0p, lp)
    x = jnp.pad(x, ((0, B_pad - B), (0, 0), (0, 0)))
    x = jnp.pad(x, ((0, 0), (0, 0), (MARG, LBUF - MARG - lp)))      # (B_pad,c0p,LBUF)
    x = x.reshape(num_groups, Bt, c0p, LBUF)
    x_packed = jnp.transpose(x, (0, 2, 1, 3)).reshape(
        num_groups, c0p, LBUF_T).astype(jnp.bfloat16)

    # Interior mask over the OUT_LEN output lanes (1 inside each image's HxW,
    # 0 on the padding ring / rounding lanes / inter-image margins).  Identical
    # for every group, so a single (1, OUT_LEN) operand with a constant
    # index_map suffices (not re-DMA'd per step).
    q = jnp.arange(OUT_LEN)
    r = (q + MARG) % LBUF
    p = r - MARG
    row, col = p // wp, p % wp
    interior = ((p >= 0) & (p < lp) & (row >= 1) & (row <= H) &
                (col >= 1) & (col <= W))
    mask = interior.astype(jnp.float32)[None, :]                    # (1, OUT_LEN)

    out = pl.pallas_call(
        functools.partial(_fused_conv3_kernel, wp, MARG),
        out_shape=jax.ShapeDtypeStruct((num_groups, 2, OUT_LEN), jnp.float32),
        grid_spec=pltpu.PrefetchScalarGridSpec(
            num_scalar_prefetch=0,
            grid=(num_groups,),
            in_specs=[
                pl.BlockSpec((1, c0p, LBUF_T), lambda g: (g, 0, 0)),
                pl.BlockSpec((1, OUT_LEN), lambda g: (0, 0)),
                pl.BlockSpec(w1k.shape, lambda g: (0, 0)),
                pl.BlockSpec(b1.shape, lambda g: (0, 0)),
                pl.BlockSpec(w2k.shape, lambda g: (0, 0)),
                pl.BlockSpec(b2.shape, lambda g: (0, 0)),
                pl.BlockSpec(w3k.shape, lambda g: (0, 0)),
                pl.BlockSpec(b3.shape, lambda g: (0, 0)),
            ],
            out_specs=pl.BlockSpec((1, 2, OUT_LEN), lambda g: (g, 0, 0)),
        ),
        compiler_params=pltpu.CompilerParams(
            dimension_semantics=("parallel",),          # v7x: both TCs get groups
            vmem_limit_bytes=_vmem_budget(c0p, hidden, LBUF_T, OUT_LEN),
        ),
    )(x_packed, mask, w1k, b1, w2k, b2, w3k, b3)

    # Unpack: image j of group g lives at output lanes [j*LBUF, j*LBUF+lp).
    imgs = jnp.stack([out[:, :, j * LBUF: j * LBUF + lp] for j in range(Bt)],
                     axis=1)                                        # (G, Bt, 2, lp)
    sd = imgs.reshape(B_pad, 2, hp, wp)[:B, :, 1:H + 1, 1:W + 1]    # crop ring
    return sd[:, 0:1], sd[:, 1:2]


# ----------------------------------------------------------------------------
# Pure-JAX reference (same synthesized conv stack) for a correctness check
# ----------------------------------------------------------------------------
def _reference_forward(params, events_forward, events_backward, img,
                       n_left, n_right):
    ev_f = events_forward / jnp.maximum(jnp.asarray(n_left, jnp.float32), 1.0)
    ev_b = events_backward / jnp.maximum(jnp.asarray(n_right, jnp.float32), 1.0)
    x = jnp.concatenate([ev_f, ev_b, img], axis=1)

    def conv(x, w, b, relu):
        y = jax.lax.conv_general_dilated(
            x, w, window_strides=(1, 1), padding="SAME",
            dimension_numbers=("NCHW", "OIHW", "NCHW"))
        y = y + b[None, :, None, None]
        return jnp.maximum(y, 0.0) if relu else y

    h = conv(x, params["enc_w1"], params["enc_b1"], True)
    f = conv(h, params["enc_w2"], params["enc_b2"], True)
    sd = conv(f, params["dec_w"], params["dec_b"], False)
    return sd[:, 0:1], sd[:, 1:2]


if __name__ == "__main__":
    B, C, H, W = 2, 3, 16, 16
    key = jax.random.PRNGKey(0)
    k1, k2, k3 = jax.random.split(key, 3)
    events_forward = jax.random.normal(k1, (B, C, H, W), jnp.float32)
    events_backward = jax.random.normal(k2, (B, C, H, W), jnp.float32)
    img = jax.random.uniform(k3, (B, C, H, W), jnp.float32)
    n_left, n_right = 4, 4

    params = init_params(channel=C, hidden=16)
    fwd = jax.jit(model_frame_pre_forward)
    S, D = fwd(params, events_forward, events_backward, img, n_left, n_right)
    jax.block_until_ready((S, D))
    assert S.shape == (B, 1, H, W) and D.shape == (B, 1, H, W)

    # NOTE: the kernel runs bf16 MXU operands (input + intermediate
    # activations) with f32 accumulation, so expect ~1e-3 absolute deviation
    # from the f32 reference; 2e-2 tolerance documents that precision budget.
    S_ref, D_ref = _reference_forward(params, events_forward, events_backward,
                                      img, n_left, n_right)
    assert jnp.allclose(S, S_ref, atol=2e-2, rtol=2e-2), \
        f"S max abs diff {float(jnp.max(jnp.abs(S - S_ref)))}"
    assert jnp.allclose(D, D_ref, atol=2e-2, rtol=2e-2), \
        f"D max abs diff {float(jnp.max(jnp.abs(D - D_ref)))}"
    print("KERNEL_OK")
</pallas_src>

<mosaic_0001>
module attributes {stable_mosaic.version = 11 : i64} {
  func.func @_fused_conv3_kernel(%arg0: i32, %arg1: memref<1x16x640xbf16, #tpu.memory_space<vmem>>, %arg2: memref<1x384xf32, #tpu.memory_space<vmem>>, %arg3: memref<16x144xbf16, #tpu.memory_space<vmem>>, %arg4: memref<16x1xf32, #tpu.memory_space<vmem>>, %arg5: memref<16x144xbf16, #tpu.memory_space<vmem>>, %arg6: memref<16x1xf32, #tpu.memory_space<vmem>>, %arg7: memref<2x144xbf16, #tpu.memory_space<vmem>>, %arg8: memref<2x1xf32, #tpu.memory_space<vmem>>, %arg9: memref<1x2x384xf32, #tpu.memory_space<vmem>>) attributes {dimension_semantics = [#tpu.dimension_semantics<parallel>], iteration_bounds = array<i64: 2>, scalar_prefetch = 0 : i64, scratch_operands = 0 : i64, tpu.core_type = #tpu.core_type<tc>, window_params = [{transform_indices = @transform_0, window_bounds = array<i64: 1, 16, 640>}, {pipeline_mode = #tpu.pipeline_mode<synchronous>, transform_indices = @transform_1, window_bounds = array<i64: 1, 384>}, {pipeline_mode = #tpu.pipeline_mode<synchronous>, transform_indices = @transform_2, window_bounds = array<i64: 16, 144>}, {pipeline_mode = #tpu.pipeline_mode<synchronous>, transform_indices = @transform_3, window_bounds = array<i64: 16, 1>}, {pipeline_mode = #tpu.pipeline_mode<synchronous>, transform_indices = @transform_4, window_bounds = array<i64: 16, 144>}, {pipeline_mode = #tpu.pipeline_mode<synchronous>, transform_indices = @transform_5, window_bounds = array<i64: 16, 1>}, {pipeline_mode = #tpu.pipeline_mode<synchronous>, transform_indices = @transform_6, window_bounds = array<i64: 2, 144>}, {pipeline_mode = #tpu.pipeline_mode<synchronous>, transform_indices = @transform_7, window_bounds = array<i64: 2, 1>}, {transform_indices = @transform_8, window_bounds = array<i64: 1, 2, 384>}]} {
    %c0 = arith.constant 0 : index
    %c0_0 = arith.constant 0 : index
    %c0_1 = arith.constant 0 : index
    %0 = vector.load %arg1[%c0, %c0_0, %c0_1] : memref<1x16x640xbf16, #tpu.memory_space<vmem>>, vector<1x16x640xbf16>
    %1 = vector.shape_cast %0 : vector<1x16x640xbf16> to vector<16x640xbf16>
    %2 = vector.extract_strided_slice %1 {offsets = [0, 109], sizes = [16, 384], strides = [1, 1]} : vector<16x640xbf16> to vector<16x384xbf16>
    %3 = vector.extract_strided_slice %1 {offsets = [0, 110], sizes = [16, 384], strides = [1, 1]} : vector<16x640xbf16> to vector<16x384xbf16>
    %4 = vector.extract_strided_slice %1 {offsets = [0, 111], sizes = [16, 384], strides = [1, 1]} : vector<16x640xbf16> to vector<16x384xbf16>
    %5 = vector.extract_strided_slice %1 {offsets = [0, 127], sizes = [16, 384], strides = [1, 1]} : vector<16x640xbf16> to vector<16x384xbf16>
    %6 = vector.extract_strided_slice %1 {offsets = [0, 128], sizes = [16, 384], strides = [1, 1]} : vector<16x640xbf16> to vector<16x384xbf16>
    %7 = vector.extract_strided_slice %1 {offsets = [0, 129], sizes = [16, 384], strides = [1, 1]} : vector<16x640xbf16> to vector<16x384xbf16>
    %8 = vector.extract_strided_slice %1 {offsets = [0, 145], sizes = [16, 384], strides = [1, 1]} : vector<16x640xbf16> to vector<16x384xbf16>
    %9 = vector.extract_strided_slice %1 {offsets = [0, 146], sizes = [16, 384], strides = [1, 1]} : vector<16x640xbf16> to vector<16x384xbf16>
    %10 = vector.extract_strided_slice %1 {offsets = [0, 147], sizes = [16, 384], strides = [1, 1]} : vector<16x640xbf16> to vector<16x384xbf16>
    %11 = tpu.concatenate %2, %3, %4, %5, %6, %7, %8, %9, %10 in 0 : vector<16x384xbf16>, vector<16x384xbf16>, vector<16x384xbf16>, vector<16x384xbf16>, vector<16x384xbf16>, vector<16x384xbf16>, vector<16x384xbf16>, vector<16x384xbf16>, vector<16x384xbf16> -> vector<144x384xbf16>
    %c0_2 = arith.constant 0 : index
    %c0_3 = arith.constant 0 : index
    %12 = vector.load %arg3[%c0_2, %c0_3] : memref<16x144xbf16, #tpu.memory_space<vmem>>, vector<16x144xbf16>
    %cst = arith.constant dense<0.000000e+00> : vector<16x384xf32>
    %13 = tpu.matmul %12, %11, %cst {dimension_numbers = #tpu.dot_dimension_numbers<[1], [0], [0], [1], [0, 0, 1, 1], [], []>} : vector<16x144xbf16>, vector<144x384xbf16>, vector<16x384xf32> -> vector<16x384xf32>
    %c0_4 = arith.constant 0 : index
    %c0_5 = arith.constant 0 : index
    %14 = vector.load %arg4[%c0_4, %c0_5] : memref<16x1xf32, #tpu.memory_space<vmem>>, vector<16x1xf32>
    %15 = vector.broadcast %14 : vector<16x1xf32> to vector<16x384xf32>
    %16 = arith.addf %13, %15 : vector<16x384xf32>
    %cst_6 = arith.constant 0.000000e+00 : f32
    %17 = vector.broadcast %cst_6 : f32 to vector<16x384xf32>
    %18 = arith.maximumf %16, %17 : vector<16x384xf32>
    %c0_7 = arith.constant 0 : index
    %c0_8 = arith.constant 0 : index
    %19 = vector.load %arg2[%c0_7, %c0_8] : memref<1x384xf32, #tpu.memory_space<vmem>>, vector<1x384xf32>
    %20 = vector.broadcast %19 : vector<1x384xf32> to vector<16x384xf32>
    %21 = arith.mulf %18, %20 : vector<16x384xf32>
    %cst_9 = arith.constant 0.000000e+00 : bf16
    %22 = vector.broadcast %cst_9 : bf16 to vector<16x128xbf16>
    %23 = arith.truncf %21 : vector<16x384xf32> to vector<16x384xbf16>
    %24 = tpu.concatenate %22, %23, %22 in 1 : vector<16x128xbf16>, vector<16x384xbf16>, vector<16x128xbf16> -> vector<16x640xbf16>
    %25 = vector.extract_strided_slice %24 {offsets = [0, 109], sizes = [16, 384], strides = [1, 1]} : vector<16x640xbf16> to vector<16x384xbf16>
    %26 = vector.extract_strided_slice %24 {offsets = [0, 110], sizes = [16, 384], strides = [1, 1]} : vector<16x640xbf16> to vector<16x384xbf16>
    %27 = vector.extract_strided_slice %24 {offsets = [0, 111], sizes = [16, 384], strides = [1, 1]} : vector<16x640xbf16> to vector<16x384xbf16>
    %28 = vector.extract_strided_slice %24 {offsets = [0, 127], sizes = [16, 384], strides = [1, 1]} : vector<16x640xbf16> to vector<16x384xbf16>
    %29 = vector.extract_strided_slice %24 {offsets = [0, 128], sizes = [16, 384], strides = [1, 1]} : vector<16x640xbf16> to vector<16x384xbf16>
    %30 = vector.extract_strided_slice %24 {offsets = [0, 129], sizes = [16, 384], strides = [1, 1]} : vector<16x640xbf16> to vector<16x384xbf16>
    %31 = vector.extract_strided_slice %24 {offsets = [0, 145], sizes = [16, 384], strides = [1, 1]} : vector<16x640xbf16> to vector<16x384xbf16>
    %32 = vector.extract_strided_slice %24 {offsets = [0, 146], sizes = [16, 384], strides = [1, 1]} : vector<16x640xbf16> to vector<16x384xbf16>
    %33 = vector.extract_strided_slice %24 {offsets = [0, 147], sizes = [16, 384], strides = [1, 1]} : vector<16x640xbf16> to vector<16x384xbf16>
    %34 = tpu.concatenate %25, %26, %27, %28, %29, %30, %31, %32, %33 in 0 : vector<16x384xbf16>, vector<16x384xbf16>, vector<16x384xbf16>, vector<16x384xbf16>, vector<16x384xbf16>, vector<16x384xbf16>, vector<16x384xbf16>, vector<16x384xbf16>, vector<16x384xbf16> -> vector<144x384xbf16>
    %c0_10 = arith.constant 0 : index
    %c0_11 = arith.constant 0 : index
    %35 = vector.load %arg5[%c0_10, %c0_11] : memref<16x144xbf16, #tpu.memory_space<vmem>>, vector<16x144xbf16>
    %cst_12 = arith.constant dense<0.000000e+00> : vector<16x384xf32>
    %36 = tpu.matmul %35, %34, %cst_12 {dimension_numbers = #tpu.dot_dimension_numbers<[1], [0], [0], [1], [0, 0, 1, 1], [], []>} : vector<16x144xbf16>, vector<144x384xbf16>, vector<16x384xf32> -> vector<16x384xf32>
    %c0_13 = arith.constant 0 : index
    %c0_14 = arith.constant 0 : index
    %37 = vector.load %arg6[%c0_13, %c0_14] : memref<16x1xf32, #tpu.memory_space<vmem>>, vector<16x1xf32>
    %38 = vector.broadcast %37 : vector<16x1xf32> to vector<16x384xf32>
    %39 = arith.addf %36, %38 : vector<16x384xf32>
    %cst_15 = arith.constant 0.000000e+00 : f32
    %40 = vector.broadcast %cst_15 : f32 to vector<16x384xf32>
    %41 = arith.maximumf %39, %40 : vector<16x384xf32>
    %c0_16 = arith.constant 0 : index
    %c0_17 = arith.constant 0 : index
    %42 = vector.load %arg2[%c0_16, %c0_17] : memref<1x384xf32, #tpu.memory_space<vmem>>, vector<1x384xf32>
    %43 = vector.broadcast %42 : vector<1x384xf32> to vector<16x384xf32>
    %44 = arith.mulf %41, %43 : vector<16x384xf32>
    %cst_18 = arith.constant 0.000000e+00 : bf16
    %45 = vector.broadcast %cst_18 : bf16 to vector<16x128xbf16>
    %46 = arith.truncf %44 : vector<16x384xf32> to vector<16x384xbf16>
    %47 = tpu.concatenate %45, %46, %45 in 1 : vector<16x128xbf16>, vector<16x384xbf16>, vector<16x128xbf16> -> vector<16x640xbf16>
    %48 = vector.extract_strided_slice %47 {offsets = [0, 109], sizes = [16, 384], strides = [1, 1]} : vector<16x640xbf16> to vector<16x384xbf16>
    %49 = vector.extract_strided_slice %47 {offsets = [0, 110], sizes = [16, 384], strides = [1, 1]} : vector<16x640xbf16> to vector<16x384xbf16>
    %50 = vector.extract_strided_slice %47 {offsets = [0, 111], sizes = [16, 384], strides = [1, 1]} : vector<16x640xbf16> to vector<16x384xbf16>
    %51 = vector.extract_strided_slice %47 {offsets = [0, 127], sizes = [16, 384], strides = [1, 1]} : vector<16x640xbf16> to vector<16x384xbf16>
    %52 = vector.extract_strided_slice %47 {offsets = [0, 128], sizes = [16, 384], strides = [1, 1]} : vector<16x640xbf16> to vector<16x384xbf16>
    %53 = vector.extract_strided_slice %47 {offsets = [0, 129], sizes = [16, 384], strides = [1, 1]} : vector<16x640xbf16> to vector<16x384xbf16>
    %54 = vector.extract_strided_slice %47 {offsets = [0, 145], sizes = [16, 384], strides = [1, 1]} : vector<16x640xbf16> to vector<16x384xbf16>
    %55 = vector.extract_strided_slice %47 {offsets = [0, 146], sizes = [16, 384], strides = [1, 1]} : vector<16x640xbf16> to vector<16x384xbf16>
    %56 = vector.extract_strided_slice %47 {offsets = [0, 147], sizes = [16, 384], strides = [1, 1]} : vector<16x640xbf16> to vector<16x384xbf16>
    %57 = tpu.concatenate %48, %49, %50, %51, %52, %53, %54, %55, %56 in 0 : vector<16x384xbf16>, vector<16x384xbf16>, vector<16x384xbf16>, vector<16x384xbf16>, vector<16x384xbf16>, vector<16x384xbf16>, vector<16x384xbf16>, vector<16x384xbf16>, vector<16x384xbf16> -> vector<144x384xbf16>
    %c0_19 = arith.constant 0 : index
    %c0_20 = arith.constant 0 : index
    %58 = vector.load %arg7[%c0_19, %c0_20] : memref<2x144xbf16, #tpu.memory_space<vmem>>, vector<2x144xbf16>
    %cst_21 = arith.constant dense<0.000000e+00> : vector<2x384xf32>
    %59 = tpu.matmul %58, %57, %cst_21 {dimension_numbers = #tpu.dot_dimension_numbers<[1], [0], [0], [1], [0, 0, 1, 1], [], []>} : vector<2x144xbf16>, vector<144x384xbf16>, vector<2x384xf32> -> vector<2x384xf32>
    %c0_22 = arith.constant 0 : index
    %c0_23 = arith.constant 0 : index
    %60 = vector.load %arg8[%c0_22, %c0_23] : memref<2x1xf32, #tpu.memory_space<vmem>>, vector<2x1xf32>
    %61 = vector.broadcast %60 : vector<2x1xf32> to vector<2x384xf32>
    %62 = arith.addf %59, %61 : vector<2x384xf32>
    %c0_24 = arith.constant 0 : index
    %c0_25 = arith.constant 0 : index
    %c0_26 = arith.constant 0 : index
    %63 = vector.load %arg9[%c0_24, %c0_25, %c0_26] : memref<1x2x384xf32, #tpu.memory_space<vmem>>, vector<1x2x384xf32>
    %64 = vector.shape_cast %63 : vector<1x2x384xf32> to vector<2x384xf32>
    %65 = vector.shape_cast %62 : vector<2x384xf32> to vector<1x2x384xf32>
    tpu.vector_store %arg9[%c0_24, %c0_25, %c0_26], %65 {strides = array<i32>} : memref<1x2x384xf32, #tpu.memory_space<vmem>>, vector<1x2x384xf32>,
    return
  }
  func.func @transform_0(%arg0: i32) -> (i32, i32, i32) {
    %c0_i32 = arith.constant 0 : i32
    %c0_i32_0 = arith.constant 0 : i32
    %c0_i32_1 = arith.constant 0 : i32
    return %arg0, %c0_i32, %c0_i32_0 : i32, i32, i32
  }
  func.func @transform_1(%arg0: i32) -> (i32, i32) {
    %c0_i32 = arith.constant 0 : i32
    %c0_i32_0 = arith.constant 0 : i32
    %c0_i32_1 = arith.constant 0 : i32
    return %c0_i32, %c0_i32_0 : i32, i32
  }
  func.func @transform_2(%arg0: i32) -> (i32, i32) {
    %c0_i32 = arith.constant 0 : i32
    %c0_i32_0 = arith.constant 0 : i32
    %c0_i32_1 = arith.constant 0 : i32
    return %c0_i32, %c0_i32_0 : i32, i32
  }
  func.func @transform_3(%arg0: i32) -> (i32, i32) {
    %c0_i32 = arith.constant 0 : i32
    %c0_i32_0 = arith.constant 0 : i32
    %c0_i32_1 = arith.constant 0 : i32
    return %c0_i32, %c0_i32_0 : i32, i32
  }
  func.func @transform_4(%arg0: i32) -> (i32, i32) {
    %c0_i32 = arith.constant 0 : i32
    %c0_i32_0 = arith.constant 0 : i32
    %c0_i32_1 = arith.constant 0 : i32
    return %c0_i32, %c0_i32_0 : i32, i32
  }
  func.func @transform_5(%arg0: i32) -> (i32, i32) {
    %c0_i32 = arith.constant 0 : i32
    %c0_i32_0 = arith.constant 0 : i32
    %c0_i32_1 = arith.constant 0 : i32
    return %c0_i32, %c0_i32_0 : i32, i32
  }
  func.func @transform_6(%arg0: i32) -> (i32, i32) {
    %c0_i32 = arith.constant 0 : i32
    %c0_i32_0 = arith.constant 0 : i32
    %c0_i32_1 = arith.constant 0 : i32
    return %c0_i32, %c0_i32_0 : i32, i32
  }
  func.func @transform_7(%arg0: i32) -> (i32, i32) {
    %c0_i32 = arith.constant 0 : i32
    %c0_i32_0 = arith.constant 0 : i32
    %c0_i32_1 = arith.constant 0 : i32
    return %c0_i32, %c0_i32_0 : i32, i32
  }
  func.func @transform_8(%arg0: i32) -> (i32, i32, i32) {
    %c0_i32 = arith.constant 0 : i32
    %c0_i32_0 = arith.constant 0 : i32
    %c0_i32_1 = arith.constant 0 : i32
    return %arg0, %c0_i32, %c0_i32_0 : i32, i32, i32
  }
}

</mosaic_0001>

<bundles_post_ra>
// kernel: model_frame_pre_forward.1
= control target key start
LH: loop header
LB: loop body
LE: loop exit
PB: predicated region body
PF: predicated region fallthrough
CT: control target
= control target key end

     0   :  { %s1553_s27 = smov 0   ;;  %s2156_s0 = inlined_call_operand.vmem [shape: bf16[2,16,640], index: 0, kind: input, shape index: {}]   ;;  %s2157_s1 = inlined_call_operand.vmem [shape: f32[1,384], index: 1, kind: input, shape index: {}]   ;;  %s2158_s2 = inlined_call_operand.vmem [shape: bf16[16,144], index: 2, kind: input, shape index: {}]   ;;  %s2159_s3 = inlined_call_operand.vmem [shape: f32[16,1], index: 3, kind: input, shape index: {}]   ;;  %s2160_s4 = inlined_call_operand.vmem [shape: bf16[16,144], index: 4, kind: input, shape index: {}]   ;;  %s2161_s5 = inlined_call_operand.vmem [shape: f32[16,1], index: 5, kind: input, shape index: {}]   ;;  %s2162_s6 = inlined_call_operand.vmem [shape: bf16[2,144], index: 6, kind: input, shape index: {}]   ;;  %s2163_s7 = inlined_call_operand.vmem [shape: f32[2,1], index: 7, kind: input, shape index: {}]   ;;  %s2164_s8 = inlined_call_operand.vmem [shape: f32[2,2,384], index: 8, kind: output, shape index: {}]  }
   0x1 LB: > { %s1426_s28 = sadd.s32 4294967295, %s1494_s27   ;;  %p1430_p0 = scmp.ge.s32.totalorder %s1494_s27, 1  ;;  %s1494_s27 = sphi %s1553_s27, %s18_s27  }
   0x2   : > { %p262_p1 = scmp.lt.s32.totalorder %s1494_s27, 3 }
   0x4   : > { %p263_p2 = pnand %p1430_p0, %p262_p1 }
   0x5   : > { %p296_p3 = scmp.lt.s32.totalorder (!%p263_p2), %s1426_s28, 1  ;;  %s1496_s11 = smov (!%p263_p2), 91  }
   0x6   : > { %266 = sbr.rel (%p263_p2) target bundleno = 1588 (0x634), region = 52  ;;  %s1497_s12 = smov (!%p263_p2), 92  }
   0x7   : > { %s1498_s13 = smov (!%p263_p2), 108   ;;  %s1499_s14 = smov (!%p263_p2), 109  }
   0x8   : > { %s1500_s15 = smov (!%p263_p2), 110   ;;  %s1501_s16 = smov (!%p263_p2), 126  }
   0x9   : > { %s1502_s17 = smov (!%p263_p2), 127   ;;  %s1503_s18 = smov (!%p263_p2), 90  }
   0xa   : > { %s1504_s19 = smov (!%p263_p2), 19  }
   0xb   : > { %s2166_s28 = smov (!%p296_p3, %s1426_s28), 1  ;;  %vm411_vm0 = vcmask 744448   ;;  %vm399_vm1 = vcmask 752640   ;;  %vm387_vm2 = vcmask 883712   ;;  %vm371_vm3 = vcmask 891904   ;;  %v429_v58 = vld [vmem:[%s2159_s3] sm:$0xff] }
   0xc   : > { %s1451_s29 = smul.u32 40, %s2166_s28  ;;  %vm361_vm4 = vcmask 900096   ;;  %v1505_v33 = vmov 0   ;;  %vm349_vm5 = vcmask 1031168   ;;  %vm337_vm6 = vcmask 1039360   ;;  %v430_v62 = vld [vmem:[%s2159_s3 + $0x8] sm:$0xff] }
   0xd   : > { %624 = vmatprep.subr.bf16.mxu1 %v1505_v33  ;;  %1473 = vset.pattern.permute.xlu1 %v1505_v33  ;;  %vm423_vm7 = vcmask 736256   ;;  %v1484_v55 = vld [vmem:[%s2158_s2 + $0x4] ss:$8 sps:$4 sm:$0xff]   ;;  %vm577_vm8 = vcmask 130048   ;;  %vm522_vm9 = vcmask 154624  }
   0xe   : > { %s300_s10 = scalar_lea.vmem %s2156_s0, %s1451_s29  ;;  %1474 = vset.pattern.permute.xlu0 %v1505_v33  ;;  %1440 = vmatprep.mubr.msk.bf16.mxu0 %vm577_vm8, %v1484_v55 }
   0xf   : > { %v1567_v0 = vld [vmem:[%s300_s10 + $0xc] ss:$20 sps:$4 sm:$0xff]   ;;  %v1477_v1 = vld [vmem:[%s300_s10 + $0x4] ss:$20 sps:$4 sm:$0xff]   ;;  %v1480_v3 = vld [vmem:[%s300_s10 + $0x8] ss:$20 sps:$4 sm:$0xff]   ;;  %1441 = vmatprep.mubr.msk.bf16.mxu1 %vm577_vm8, %v1484_v55 }
  0x10   : > { %407 = vrot.lane.b32.xlu1 %v1567_v0, %s1496_s11  ;;  %v1479_v2 = vld [vmem:[%s300_s10 + $0x10] ss:$20 sps:$4 sm:$0xff]   ;;  %403 = vrot.lane.b32.xlu0 %v1477_v1, %s1496_s11  ;;  %v1481_v4 = vld [vmem:[%s300_s10] ss:$20 sps:$4 sm:$0xff]  }
  0x14   : > { %409 = vrot.lane.b32.xlu1 %v1479_v2, %s1496_s11  ;;  %405 = vrot.lane.b32.xlu0 %v1480_v3, %s1496_s11 }
  0x18   : > { %393 = vrot.lane.b32.xlu1 %v1480_v3, %s1497_s12  ;;  %391 = vrot.lane.b32.xlu0 %v1477_v1, %s1497_s12 }
  0x1c   : > { %397 = vrot.lane.b32.xlu1 %v1479_v2, %s1497_s12  ;;  %395 = vrot.lane.b32.xlu0 %v1567_v0, %s1497_s12 }
  0x20   : > { %381 = vrot.lane.b32.xlu1 %v1480_v3, %s1498_s13  ;;  %379 = vrot.lane.b32.xlu0 %v1477_v1, %s1498_s13 }
  0x24   : > { %385 = vrot.lane.b32.xlu1 %v1479_v2, %s1498_s13  ;;  %383 = vrot.lane.b32.xlu0 %v1567_v0, %s1498_s13 }
  0x28   : > { %367 = vrot.lane.b32.xlu1 %v1480_v3, %s1499_s14  ;;  %365 = vrot.lane.b32.xlu0 %v1477_v1, %s1499_s14 }
  0x2c   : > { %355 = vrot.lane.b32.xlu1 %v1477_v1, %s1500_s15  ;;  %369 = vrot.lane.b32.xlu0 %v1567_v0, %s1499_s14 }
  0x30   : > { %359 = vrot.lane.b32.xlu1 %v1567_v0, %s1500_s15  ;;  %357 = vrot.lane.b32.xlu0 %v1480_v3, %s1500_s15 }
  0x34   : > { %343 = vrot.lane.b32.xlu1 %v1477_v1, %s1501_s16  ;;  %353 = vrot.lane.b32.xlu0 %v1481_v4, %s1500_s15 }
  0x38   : > { %347 = vrot.lane.b32.xlu1 %v1567_v0, %s1501_s16  ;;  %345 = vrot.lane.b32.xlu0 %v1480_v3, %s1501_s16 }
  0x3c   : > { %331 = vrot.lane.b32.xlu1 %v1477_v1, %s1502_s17  ;;  %341 = vrot.lane.b32.xlu0 %v1481_v4, %s1501_s16 }
  0x40   : > { %335 = vrot.lane.b32.xlu1 %v1567_v0, %s1502_s17  ;;  %333 = vrot.lane.b32.xlu0 %v1480_v3, %s1502_s17 }
  0x44   : > { %415 = vrot.lane.b32.xlu1 %v1477_v1, %s1503_s18  ;;  %329 = vrot.lane.b32.xlu0 %v1481_v4, %s1502_s17 }
  0x48   : > { %419 = vrot.lane.b32.xlu1 %v1567_v0, %s1503_s18  ;;  %417 = vrot.lane.b32.xlu0 %v1480_v3, %s1503_s18 }
  0x4c   : > { %452 = vrot.lane.b32.xlu1 %v1477_v1, %s1504_s19  ;;  %421 = vrot.lane.b32.xlu0 %v1479_v2, %s1503_s18 }
  0x50   : > { %450 = vrot.lane.b32.xlu1 %v1481_v4, %s1504_s19  ;;  %454 = vrot.lane.b32.xlu0 %v1480_v3, %s1504_s19 }
  0x82   : > { %v408_v5 = vpop.permute.xlu1 %407  ;;  %v404_v6 = vpop.permute.xlu0 %403 }
  0x83   : > { %506 = vrot.lane.b32.xlu1 %v404_v6, %s1504_s19 }
  0x86   : > { %v410_v7 = vpop.permute.xlu1 %409  ;;  %v406_v8 = vpop.permute.xlu0 %405 }
  0x87   : > { %v412_v21 = vsel %vm411_vm0, %v404_v6, %v406_v8  ;;  %v413_v37 = vsel %vm411_vm0, %v406_v8, %v408_v5  ;;  %v414_v40 = vsel %vm411_vm0, %v408_v5, %v410_v7 }
  0x8a   : > { %v394_v9 = vpop.permute.xlu1 %393  ;;  %v392_v10 = vpop.permute.xlu0 %391 }
  0x8b   : > { %498 = vrot.lane.b32.xlu1 %v392_v10, %s1504_s19  ;;  %v400_v24 = vsel %vm399_vm1, %v392_v10, %v394_v9 }
  0x8e   : > { %v1613_v11 = vpop.permute.xlu1 %397  ;;  %v396_v12 = vpop.permute.xlu0 %395 }
  0x8f   : > { %v401_v43 = vsel %vm399_vm1, %v394_v9, %v396_v12  ;;  %v402_v45 = vsel %vm399_vm1, %v396_v12, %v1613_v11 }
  0x92   : > { %v1615_v13 = vpop.permute.xlu1 %381  ;;  %v380_v14 = vpop.permute.xlu0 %379 }
  0x93   : > { %490 = vrot.lane.b32.xlu1 %v380_v14, %s1504_s19  ;;  %v388_v27 = vsel %vm387_vm2, %v380_v14, %v1615_v13 }
  0x96   : > { %v1618_v15 = vpop.permute.xlu1 %385  ;;  %v1620_v16 = vpop.permute.xlu0 %383 }
  0x97   : > { %v389_v50 = vsel %vm387_vm2, %v1615_v13, %v1620_v16  ;;  %v390_v51 = vsel %vm387_vm2, %v1620_v16, %v1618_v15 }
  0x9a   : > { %v1622_v17 = vpop.permute.xlu1 %367  ;;  %v366_v18 = vpop.permute.xlu0 %365 }
  0x9b   : > { %482 = vrot.lane.b32.xlu1 %v366_v18, %s1504_s19  ;;  %v372_v29 = vsel %vm371_vm3, %v366_v18, %v1622_v17 }
  0x9e   : > { %v356_v19 = vpop.permute.xlu1 %355  ;;  %v1625_v20 = vpop.permute.xlu0 %369 }
  0x9f   : > { %508 = vrot.lane.b32.xlu1 %v412_v21, %s1504_s19  ;;  %488 = vrot.lane.b32.xlu0 %v1625_v20, %s1504_s19  ;;  %v373_v52 = vsel %vm371_vm3, %v1622_v17, %v1625_v20 }
  0xa2   : > { %v360_v22 = vpop.permute.xlu1 %359  ;;  %v358_v23 = vpop.permute.xlu0 %357 }
  0xa3   : > { %500 = vrot.lane.b32.xlu1 %v400_v24, %s1504_s19  ;;  %480 = vrot.lane.b32.xlu0 %v360_v22, %s1504_s19  ;;  %v363_v32 = vsel %vm361_vm4, %v356_v19, %v358_v23  ;;  %v364_v53 = vsel %vm361_vm4, %v358_v23, %v360_v22 }
  0xa6   : > { %v344_v25 = vpop.permute.xlu1 %343  ;;  %v354_v26 = vpop.permute.xlu0 %353 }
  0xa7   : > { %492 = vrot.lane.b32.xlu1 %v388_v27, %s1504_s19  ;;  %v362_v36 = vsel %vm361_vm4, %v354_v26, %v356_v19 }
  0xaa   : > { %v348_v28 = vpop.permute.xlu1 %347  ;;  %v346_v30 = vpop.permute.xlu0 %345 }
  0xab   : > { %472 = vrot.lane.b32.xlu0 %v348_v28, %s1504_s19  ;;  %484 = vrot.lane.b32.xlu1 %v372_v29, %s1504_s19  ;;  %v351_v38 = vsel %vm349_vm5, %v344_v25, %v346_v30  ;;  %v352_v54 = vsel %vm349_vm5, %v346_v30, %v348_v28 }
  0xae   : > { %v332_v31 = vpop.permute.xlu1 %331  ;;  %v342_v34 = vpop.permute.xlu0 %341 }
  0xaf   : > { %476 = vrot.lane.b32.xlu1 %v363_v32, %s1504_s19  ;;  %v350_v41 = vsel %vm349_vm5, %v342_v34, %v344_v25 }
  0xb2   : > { %v336_v35 = vpop.permute.xlu1 %335  ;;  %v334_v39 = vpop.permute.xlu0 %333 }
  0xb3   : > { %464 = vrot.lane.b32.xlu0 %v336_v35, %s1504_s19  ;;  %474 = vrot.lane.b32.xlu1 %v362_v36, %s1504_s19  ;;  %v339_v44 = vsel %vm337_vm6, %v332_v31, %v334_v39  ;;  %v340_v56 = vsel %vm337_vm6, %v334_v39, %v336_v35 }
  0xb6   : > { %v330_v42 = vpop.permute.xlu0 %329  ;;  %v416_v46 = vpop.permute.xlu1 %415 }
  0xb7   : > { %510 = vrot.lane.b32.xlu0 %v413_v37, %s1504_s19  ;;  %468 = vrot.lane.b32.xlu1 %v351_v38, %s1504_s19  ;;  %v338_v48 = vsel %vm337_vm6, %v330_v42, %v332_v31 }
  0xba   : > { %v418_v47 = vpop.permute.xlu0 %417  ;;  %v420_v57 = vpop.permute.xlu1 %419 }
  0xbb   : > { %512 = vrot.lane.b32.xlu0 %v414_v40, %s1504_s19  ;;  %466 = vrot.lane.b32.xlu1 %v350_v41, %s1504_s19  ;;  %v424_v49 = vsel %vm423_vm7, %v416_v46, %v418_v47  ;;  %v425_v59 = vsel %vm423_vm7, %v418_v47, %v420_v57 }
  0xbe   : > { %v422_v60 = vpop.permute.xlu0 %421  ;;  %v1712_v63 = vpop.permute.xlu1 %452 }
  0xbf   : > { %502 = vrot.lane.b32.xlu0 %v401_v43, %s1504_s19  ;;  %460 = vrot.lane.b32.xlu1 %v339_v44, %s1504_s19  ;;  %v426_v61 = vsel %vm423_vm7, %v420_v57, %v422_v60 }
  0xc2   : > { %v1720_v5 = vpop.permute.xlu0 %454 }
  0xc3   : > { %504 = vrot.lane.b32.xlu0 %v402_v45, %s1504_s19  ;;  %458 = vrot.lane.b32.xlu1 %v338_v48, %s1504_s19 }
  0xc7   : > { %494 = vrot.lane.b32.xlu0 %v389_v50, %s1504_s19  ;;  %516 = vrot.lane.b32.xlu1 %v424_v49, %s1504_s19 }
  0xcb   : > { %496 = vrot.lane.b32.xlu0 %v390_v51, %s1504_s19  ;;  %514 = vrot.lane.b32.xlu1 %v416_v46, %s1504_s19 }
  0xcf   : > { %486 = vrot.lane.b32.xlu0 %v373_v52, %s1504_s19  ;;  %433 = vperm.xlu1 %1473, %v429_v58  }
  0xd3   : > { %478 = vrot.lane.b32.xlu0 %v364_v53, %s1504_s19  ;;  %770 = vrot.lane.b32.xlu1 %v1505_v33, %s1496_s11  ;;  %v524_v53 = vsel %vm522_vm9, %v1712_v63, %v1720_v5 }
  0xd7   : > { %470 = vrot.lane.b32.xlu0 %v352_v54, %s1504_s19  ;;  %759 = vrot.lane.b32.xlu1 %v1505_v33, %s1497_s12 }
  0xdb   : > { %462 = vrot.lane.b32.xlu0 %v340_v56, %s1504_s19  ;;  %748 = vrot.lane.b32.xlu1 %v1505_v33, %s1498_s13 }
  0xdf   : > { %456 = vrot.lane.b32.xlu0 %v1567_v0, %s1504_s19  ;;  %v1718_v0 = vpop.permute.xlu1 %450 }
  0xe0   : > { %v523_v56 = vsel %vm522_vm9, %v1718_v0, %v1712_v63  ;;  %v673_v63 = vlaneseq }
  0xe2   : > { %v1769_v0 = vshrl.u32 %v673_v63, 7 }
  0xe3   : > { %518 = vrot.lane.b32.xlu0 %v425_v59, %s1504_s19 }
  0xe7   : > { %520 = vrot.lane.b32.xlu0 %v426_v61, %s1504_s19  ;;  %v1482_v61 = vld [vmem:[%s2158_s2] ss:$8 sps:$4 sm:$0xff]  }
  0xeb   : > { %438 = vperm.xlu0 %1474, %v430_v62  }
  0xef   : > { %723 = vrot.lane.b32.xlu0 %v1505_v33, %s1500_s15 }
  0xf3   : > { %712 = vrot.lane.b32.xlu0 %v1505_v33, %s1501_s16 }
  0xf5   : > { %v507_v1 = vpop.permute.xlu1 %506 }
  0xf7   : > { %701 = vrot.lane.b32.xlu0 %v1505_v33, %s1502_s17 }
  0xfd   : > { %v499_v2 = vpop.permute.xlu1 %498 }
 0x105   : > { %v491_v3 = vpop.permute.xlu1 %490 }
 0x10d   : > { %v483_v4 = vpop.permute.xlu1 %482 }
 0x111   : > { %v509_v6 = vpop.permute.xlu1 %508  ;;  %v489_v7 = vpop.permute.xlu0 %488 }
 0x112   : > { %v544_v16 = vsel %vm522_vm9, %v507_v1, %v509_v6 }
 0x115   : > { %v501_v8 = vpop.permute.xlu1 %500  ;;  %v481_v9 = vpop.permute.xlu0 %480 }
 0x116   : > { %v541_v23 = vsel %vm522_vm9, %v499_v2, %v501_v8 }
 0x119   : > { %v493_v10 = vpop.permute.xlu1 %492 }
 0x11a   : > { %v538_v29 = vsel %vm522_vm9, %v491_v3, %v493_v10 }
 0x11d   : > { %v473_v11 = vpop.permute.xlu0 %472  ;;  %v485_v13 = vpop.permute.xlu1 %484 }
 0x11e   : > { %v535_v37 = vsel %vm522_vm9, %v483_v4, %v485_v13 }
 0x121   : > { %v477_v17 = vpop.permute.xlu1 %476 }
 0x125   : > { %v1722_v12 = vpop.permute.xlu0 %464  ;;  %v475_v21 = vpop.permute.xlu1 %474 }
 0x126   : > { %v532_v42 = vsel %vm522_vm9, %v475_v21, %v477_v17 }
 0x129   : > { %v511_v14 = vpop.permute.xlu0 %510  ;;  %v469_v26 = vpop.permute.xlu1 %468 }
 0x12a   : > { %v545_v15 = vsel %vm522_vm9, %v509_v6, %v511_v14 }
 0x12b   : > { %581 = vmatprep.subr.bf16.mxu0 %v545_v15 }
 0x12c   : > { %582 = vmatpush1.bf16.msra.mxu0 %v544_v16 }
 0x12d   : > { %v513_v18 = vpop.permute.xlu0 %512  ;;  %v467_v31 = vpop.permute.xlu1 %466 }
 0x12e   : > { %v546_v19 = vsel %vm522_vm9, %v511_v14, %v513_v18  ;;  %v529_v47 = vsel %vm522_vm9, %v467_v31, %v469_v26 }
 0x12f   : > { %625 = vmatpush1.bf16.msra.mxu1 %v546_v19 }
 0x130   : > { %626 = vmatprep.subr.bf16.mxu1 %v1505_v33 }
 0x131   : > { %v503_v20 = vpop.permute.xlu0 %502  ;;  %v461_v38 = vpop.permute.xlu1 %460 }
 0x132   : > { %v542_v22 = vsel %vm522_vm9, %v501_v8, %v503_v20  ;;  %v671_v8 = vld [vmem:[%s2157_s1] sm:$0x7] }
 0x133   : > { %583 = vmatprep.subr.bf16.mxu0 %v542_v22 }
 0x134   : > { %584 = vmatpush1.bf16.msra.mxu0 %v541_v23 }
 0x135   : > { %v505_v24 = vpop.permute.xlu0 %504  ;;  %v459_v44 = vpop.permute.xlu1 %458 }
 0x136   : > { %v543_v25 = vsel %vm522_vm9, %v503_v20, %v505_v24  ;;  %v526_v52 = vsel %vm522_vm9, %v459_v44, %v461_v38  ;;  %v675_v20 = vsub.s32 0, %v1769_v0 }
 0x137   : > { %627 = vmatpush1.bf16.msra.mxu1 %v543_v25 }
 0x138   : > { %628 = vmatprep.subr.bf16.mxu1 %v1505_v33  ;;  %v1786_v24 = vrot.slane %v671_v8, %v675_v20 }
 0x139   : > { %v495_v27 = vpop.permute.xlu0 %494  ;;  %v517_v49 = vpop.permute.xlu1 %516 }
 0x13a   : > { %v539_v28 = vsel %vm522_vm9, %v493_v10, %v495_v27 }
 0x13b   : > { %585 = vmatprep.subr.bf16.mxu0 %v539_v28 }
 0x13c   : > { %586 = vmatpush1.bf16.msra.mxu0 %v538_v29 }
 0x13d   : > { %v497_v30 = vpop.permute.xlu0 %496  ;;  %v515_v57 = vpop.permute.xlu1 %514 }
 0x13e   : > { %v540_v32 = vsel %vm522_vm9, %v495_v27, %v497_v30  ;;  %v547_v60 = vsel %vm522_vm9, %v515_v57, %v517_v49 }
 0x13f   : > { %629 = vmatpush1.bf16.msra.mxu1 %v540_v32  ;;  %v679_v32 = vsub.s32 1, %v1769_v0 }
 0x140   : > { %630 = vmatprep.subr.bf16.mxu1 %v1505_v33 }
 0x141   : > { %v487_v34 = vpop.permute.xlu0 %486 }
 0x142   : > { %v536_v35 = vsel %vm522_vm9, %v485_v13, %v487_v34  ;;  %v537_v36 = vsel %vm522_vm9, %v487_v34, %v489_v7 }
 0x143   : > { %587 = vmatprep.subr.bf16.mxu0 %v536_v35  ;;  %631 = vmatpush1.bf16.msra.mxu1 %v537_v36  ;;  %v1804_v36 = vrot.slane %v671_v8, %v679_v32 }
 0x144   : > { %588 = vmatpush1.bf16.msra.mxu0 %v535_v37  ;;  %632 = vmatprep.subr.bf16.mxu1 %v1505_v33 }
 0x145   : > { %v479_v39 = vpop.permute.xlu0 %478 }
 0x146   : > { %v533_v40 = vsel %vm522_vm9, %v477_v17, %v479_v39  ;;  %v534_v41 = vsel %vm522_vm9, %v479_v39, %v481_v9 }
 0x147   : > { %589 = vmatprep.subr.bf16.mxu0 %v533_v40  ;;  %633 = vmatpush1.bf16.msra.mxu1 %v534_v41 }
 0x148   : > { %590 = vmatpush1.bf16.msra.mxu0 %v532_v42  ;;  %634 = vmatprep.subr.bf16.mxu1 %v1505_v33 }
 0x149   : > { %v471_v43 = vpop.permute.xlu0 %470 }
 0x14a   : > { %v530_v45 = vsel %vm522_vm9, %v469_v26, %v471_v43  ;;  %v531_v46 = vsel %vm522_vm9, %v471_v43, %v473_v11  ;;  %v434_v2 = vpop.permute.xlu1 %433 }
 0x14b   : > { %591 = vmatprep.subr.bf16.mxu0 %v530_v45  ;;  %635 = vmatpush1.bf16.msra.mxu1 %v531_v46 }
 0x14c   : > { %592 = vmatpush1.bf16.msra.mxu0 %v529_v47  ;;  %636 = vmatprep.subr.bf16.mxu1 %v1505_v33 }
 0x14d   : > { %v463_v48 = vpop.permute.xlu0 %462 }
 0x14e   : > { %v527_v50 = vsel %vm522_vm9, %v461_v38, %v463_v48  ;;  %v528_v51 = vsel %vm522_vm9, %v463_v48, %v1722_v12  ;;  %v1827_v41 = vpop.permute.xlu1 %770 }
 0x14f   : > { %593 = vmatprep.subr.bf16.mxu0 %v527_v50  ;;  %637 = vmatpush1.bf16.msra.mxu1 %v528_v51 }
 0x150   : > { %594 = vmatpush1.bf16.msra.mxu0 %v526_v52  ;;  %638 = vmatprep.subr.bf16.mxu1 %v1505_v33 }
 0x151   : > { %595 = vmatprep.subr.bf16.mxu0 %v524_v53  ;;  %v457_v54 = vpop.permute.xlu0 %456 }
 0x152   : > { %v525_v55 = vsel %vm522_vm9, %v1720_v5, %v457_v54  ;;  %v683_v5 = vsub.s32 2, %v1769_v0  ;;  %v1831_v43 = vpop.permute.xlu1 %759 }
 0x153   : > { %639 = vmatpush1.bf16.msra.mxu1 %v525_v55 }
 0x154   : > { %596 = vmatpush1.bf16.msra.mxu0 %v523_v56  ;;  %654 = vmatprep.subr.bf16.mxu1 %v1505_v33  ;;  %v1775_v12 = vrot.slane %v671_v8, %v683_v5 }
 0x155   : > { %v519_v58 = vpop.permute.xlu0 %518 }
 0x156   : > { %v548_v59 = vsel %vm522_vm9, %v517_v49, %v519_v58  ;;  %v1835_v45 = vpop.permute.xlu1 %748 }
 0x157   : > { %611 = vmatprep.subr.bf16.mxu0 %v548_v59 }
 0x158   : > { %612 = vmatpush2.bf16.msra.mxu0 %v547_v60 }
 0x159   : > { %v521_v62 = vpop.permute.xlu0 %520 }
 0x15a   : > { %v549_v1 = vsel %vm522_vm9, %v519_v58, %v521_v62 }
 0x15b   : > { %655 = vmatpush2.bf16.msra.mxu1 %v549_v1  ;;  %614 = vmatmul.mubr.bf16.vlgmr.msra.gmra.mxu0 %v1482_v61 }
 0x15c   : > { %981 = vmatprep.subr.bf16.mxu1 %v1505_v33 }
 0x15e   : > { %657 = vmatmul.mubr.bf16.vlgmr.msra.gmra.mxu1 %v1482_v61 }
 0x166   : > { %v439_v6 = vpop.permute.xlu0 %438 }
 0x16a   : > { %v1829_v42 = vpop.permute.xlu0 %723 }
 0x16e   : > { %v1833_v44 = vpop.permute.xlu0 %712 }
 0x172   : > { %v1837_v46 = vpop.permute.xlu0 %701 }
 0x21b   : > { %v615_v7 = vpop.f32.mrf.mxu0 }
 0x21c   : > { %v616_v21 = vadd.f32 %v615_v7, %v434_v2 }
 0x21d   : > { %v617_v14 = vpop.f32.mrf.mxu0 }
 0x21e   : > { %v658_v3 = vpop.f32.mrf.mxu1  ;;  %v665_v25 = vmax.f32 %v616_v21, 0.0  ;;  %v618_v31 = vadd.f32 %v617_v14, %v434_v2 }
 0x21f   : > { %v659_v4 = vadd.f32 %v658_v3, %v434_v2  ;;  %v619_v19 = vpop.f32.mrf.mxu0 }
 0x220   : > { %v660_v9 = vpop.f32.mrf.mxu1  ;;  %v620_v22 = vadd.f32 %v619_v19, %v439_v6  ;;  %v688_v27 = vmul.f32 %v1786_v24, %v665_v25  ;;  %v666_v35 = vmax.f32 %v618_v31, 0.0 }
 0x221   : > { %v667_v11 = vmax.f32 %v659_v4, 0.0  ;;  %v621_v30 = vpop.f32.mrf.mxu0 }
 0x222   : > { %v661_v10 = vpop.f32.mrf.mxu1  ;;  %v668_v26 = vmax.f32 %v620_v22, 0.0  ;;  %v622_v34 = vadd.f32 %v621_v30, %v439_v6  ;;  %v689_v38 = vmul.f32 %v1804_v36, %v666_v35  ;;  %v1485_v30 = vld [vmem:[%s2160_s4 + $0x4] ss:$8 sps:$4 sm:$0xff]  }
 0x223   : > { %v662_v13 = vadd.f32 %v661_v10, %v439_v6  ;;  %v690_v17 = vmul.f32 %v1775_v12, %v667_v11  ;;  %1444 = vmatprep.mubr.msk.bf16.mxu0 %vm577_vm8, %v1485_v30  ;;  %1445 = vmatprep.mubr.msk.bf16.mxu1 %vm577_vm8, %v1485_v30 }
 0x224   : > { %v663_v15 = vpop.f32.mrf.mxu1  ;;  %v691_v28 = vmul.f32 %v1786_v24, %v668_v26  ;;  %v669_v37 = vmax.f32 %v622_v34, 0.0 }
 0x225   : > { %v670_v16 = vmax.f32 %v662_v13, 0.0 }
 0x226   : > { %v694_v29 = vpack.c.bf16 %v691_v28, %v688_v27  ;;  %v692_v39 = vmul.f32 %v1804_v36, %v669_v37 }
 0x227   : > { %v693_v18 = vmul.f32 %v1775_v12, %v670_v16 }
 0x228   : > { %v695_v40 = vpack.c.bf16 %v692_v39, %v689_v38  ;;  %v788_v38 = vld [vmem:[%s2161_s5] sm:$0xff] }
 0x229   : > { %v1780_v23 = vpack.c.bf16 %v693_v18, %v690_v17 }
 0x22b   : > { %729 = vrot.lane.b32.xlu1 %v1780_v23, %s1500_s15  ;;  %768 = vrot.lane.b32.xlu0 %v1780_v23, %s1496_s11 }
 0x22f   : > { %718 = vrot.lane.b32.xlu1 %v1780_v23, %s1501_s16  ;;  %757 = vrot.lane.b32.xlu0 %v1780_v23, %s1497_s12 }
 0x233   : > { %707 = vrot.lane.b32.xlu1 %v1780_v23, %s1502_s17  ;;  %746 = vrot.lane.b32.xlu0 %v1780_v23, %s1498_s13 }
 0x237   : > { %738 = vrot.lane.b32.xlu0 %v1780_v23, %s1499_s14  ;;  %764 = vrot.lane.b32.xlu1 %v694_v29, %s1496_s11 }
 0x23b   : > { %753 = vrot.lane.b32.xlu0 %v694_v29, %s1497_s12  ;;  %725 = vrot.lane.b32.xlu1 %v694_v29, %s1500_s15 }
 0x23f   : > { %742 = vrot.lane.b32.xlu0 %v694_v29, %s1498_s13  ;;  %714 = vrot.lane.b32.xlu1 %v694_v29, %s1501_s16 }
 0x243   : > { %734 = vrot.lane.b32.xlu0 %v694_v29, %s1499_s14  ;;  %703 = vrot.lane.b32.xlu1 %v694_v29, %s1502_s17 }
 0x247   : > { %781 = vrot.lane.b32.xlu0 %v1505_v33, %s1503_s18  ;;  %766 = vrot.lane.b32.xlu1 %v695_v40, %s1496_s11 }
 0x24b   : > { %727 = vrot.lane.b32.xlu0 %v695_v40, %s1500_s15  ;;  %755 = vrot.lane.b32.xlu1 %v695_v40, %s1497_s12 }
 0x24f   : > { %716 = vrot.lane.b32.xlu0 %v695_v40, %s1501_s16  ;;  %744 = vrot.lane.b32.xlu1 %v695_v40, %s1498_s13 }
 0x253   : > { %705 = vrot.lane.b32.xlu0 %v695_v40, %s1502_s17  ;;  %736 = vrot.lane.b32.xlu1 %v695_v40, %s1499_s14 }
 0x257   : > { %777 = vrot.lane.b32.xlu0 %v695_v40, %s1503_s18  ;;  %775 = vrot.lane.b32.xlu1 %v694_v29, %s1503_s18 }
 0x25b   : > { %813 = vrot.lane.b32.xlu0 %v695_v40, %s1504_s19  ;;  %779 = vrot.lane.b32.xlu1 %v1780_v23, %s1503_s18 }
 0x25f   : > { %811 = vrot.lane.b32.xlu1 %v694_v29, %s1504_s19 }
 0x29d   : > { %v730_v47 = vpop.permute.xlu1 %729  ;;  %v769_v48 = vpop.permute.xlu0 %768 }
 0x29e   : > { %v774_v61 = vsel %vm411_vm0, %v769_v48, %v1827_v41 }
 0x2a1   : > { %v719_v49 = vpop.permute.xlu1 %718  ;;  %v758_v50 = vpop.permute.xlu0 %757 }
 0x2a2   : > { %v763_v63 = vsel %vm399_vm1, %v758_v50, %v1831_v43 }
 0x2a5   : > { %v1839_v51 = vpop.permute.xlu1 %707  ;;  %v747_v52 = vpop.permute.xlu0 %746 }
 0x2a6   : > { %v752_v3 = vsel %vm387_vm2, %v747_v52, %v1835_v45 }
 0x2a9   : > { %v765_v53 = vpop.permute.xlu1 %764  ;;  %v739_v54 = vpop.permute.xlu0 %738 }
 0x2aa   : > { %865 = vrot.lane.b32.xlu1 %v765_v53, %s1504_s19  ;;  %847 = vrot.lane.b32.xlu0 %v739_v54, %s1504_s19 }
 0x2ad   : > { %v726_v55 = vpop.permute.xlu1 %725  ;;  %v754_v56 = vpop.permute.xlu0 %753 }
 0x2ae   : > { %839 = vrot.lane.b32.xlu0 %v730_v47, %s1504_s19  ;;  %857 = vrot.lane.b32.xlu1 %v754_v56, %s1504_s19  ;;  %v731_v62 = vsel %vm361_vm4, %v1829_v42, %v726_v55 }
 0x2b1   : > { %v715_v57 = vpop.permute.xlu1 %714  ;;  %v743_v58 = vpop.permute.xlu0 %742 }
 0x2b2   : > { %831 = vrot.lane.b32.xlu0 %v719_v49, %s1504_s19  ;;  %849 = vrot.lane.b32.xlu1 %v743_v58, %s1504_s19  ;;  %v720_v2 = vsel %vm349_vm5, %v1833_v44, %v715_v57 }
 0x2b5   : > { %v735_v59 = vpop.permute.xlu0 %734  ;;  %v704_v60 = vpop.permute.xlu1 %703 }
 0x2b6   : > { %823 = vrot.lane.b32.xlu0 %v1839_v51, %s1504_s19  ;;  %841 = vrot.lane.b32.xlu1 %v735_v59, %s1504_s19  ;;  %v709_v4 = vsel %vm337_vm6, %v1837_v46, %v704_v60 }
 0x2b9   : > { %v767_v1 = vpop.permute.xlu1 %766  ;;  %v1872_v8 = vpop.permute.xlu0 %781 }
 0x2ba   : > { %871 = vrot.lane.b32.xlu0 %v774_v61, %s1504_s19  ;;  %833 = vrot.lane.b32.xlu1 %v731_v62, %s1504_s19  ;;  %v773_v6 = vsel %vm411_vm0, %v767_v1, %v769_v48  ;;  %v772_v7 = vsel %vm411_vm0, %v765_v53, %v767_v1 }
 0x2bd   : > { %v756_v5 = vpop.permute.xlu1 %755  ;;  %v728_v15 = vpop.permute.xlu0 %727 }
 0x2be   : > { %863 = vrot.lane.b32.xlu0 %v763_v63, %s1504_s19  ;;  %825 = vrot.lane.b32.xlu1 %v720_v2, %s1504_s19  ;;  %v762_v10 = vsel %vm399_vm1, %v756_v5, %v758_v50  ;;  %v761_v11 = vsel %vm399_vm1, %v754_v56, %v756_v5  ;;  %v733_v20 = vsel %vm361_vm4, %v728_v15, %v730_v47 }
 0x2bf   : > { %v732_v21 = vsel %vm361_vm4, %v726_v55, %v728_v15 }
 0x2c1   : > { %v745_v9 = vpop.permute.xlu1 %744  ;;  %v717_v19 = vpop.permute.xlu0 %716 }
 0x2c2   : > { %855 = vrot.lane.b32.xlu0 %v752_v3, %s1504_s19  ;;  %817 = vrot.lane.b32.xlu1 %v709_v4, %s1504_s19  ;;  %v751_v13 = vsel %vm387_vm2, %v745_v9, %v747_v52  ;;  %v750_v14 = vsel %vm387_vm2, %v743_v58, %v745_v9  ;;  %v722_v22 = vsel %vm349_vm5, %v717_v19, %v719_v49 }
 0x2c3   : > { %v721_v25 = vsel %vm349_vm5, %v715_v57, %v717_v19 }
 0x2c5   : > { %v737_v16 = vpop.permute.xlu1 %736  ;;  %v706_v26 = vpop.permute.xlu0 %705 }
 0x2c6   : > { %869 = vrot.lane.b32.xlu0 %v773_v6, %s1504_s19  ;;  %867 = vrot.lane.b32.xlu1 %v772_v7, %s1504_s19  ;;  %v741_v17 = vsel %vm371_vm3, %v737_v16, %v739_v54  ;;  %v740_v18 = vsel %vm371_vm3, %v735_v59, %v737_v16  ;;  %v711_v28 = vsel %vm337_vm6, %v706_v26, %v1839_v51 }
 0x2c7   : > { %v710_v29 = vsel %vm337_vm6, %v704_v60, %v706_v26 }
 0x2c9   : > { %v776_v27 = vpop.permute.xlu1 %775  ;;  %v778_v31 = vpop.permute.xlu0 %777 }
 0x2ca   : > { %861 = vrot.lane.b32.xlu0 %v762_v10, %s1504_s19  ;;  %859 = vrot.lane.b32.xlu1 %v761_v11, %s1504_s19  ;;  %v783_v35 = vsel %vm423_vm7, %v776_v27, %v778_v31 }
 0x2cd   : > { %v780_v32 = vpop.permute.xlu1 %779  ;;  %v1922_v39 = vpop.permute.xlu0 %813 }
 0x2ce   : > { %853 = vrot.lane.b32.xlu0 %v751_v13, %s1504_s19  ;;  %851 = vrot.lane.b32.xlu1 %v750_v14, %s1504_s19  ;;  %v784_v34 = vsel %vm423_vm7, %v778_v31, %v780_v32  ;;  %v785_v37 = vsel %vm423_vm7, %v780_v32, %v1872_v8 }
 0x2d1   : > { %v1924_v40 = vpop.permute.xlu1 %811 }
 0x2d2   : > { %845 = vrot.lane.b32.xlu0 %v741_v17, %s1504_s19  ;;  %843 = vrot.lane.b32.xlu1 %v740_v18, %s1504_s19 }
 0x2d6   : > { %837 = vrot.lane.b32.xlu0 %v733_v20, %s1504_s19  ;;  %835 = vrot.lane.b32.xlu1 %v732_v21, %s1504_s19 }
 0x2da   : > { %829 = vrot.lane.b32.xlu0 %v722_v22, %s1504_s19  ;;  %827 = vrot.lane.b32.xlu1 %v721_v25, %s1504_s19 }
 0x2de   : > { %821 = vrot.lane.b32.xlu0 %v711_v28, %s1504_s19  ;;  %819 = vrot.lane.b32.xlu1 %v710_v29, %s1504_s19 }
 0x2e2   : > { %815 = vrot.lane.b32.xlu0 %v1780_v23, %s1504_s19  ;;  %809 = vrot.lane.b32.xlu1 %v1505_v33, %s1504_s19  ;;  %v789_v23 = vld [vmem:[%s2161_s5 + $0x8] sm:$0xff] }
 0x2e6   : > { %877 = vrot.lane.b32.xlu0 %v784_v34, %s1504_s19  ;;  %875 = vrot.lane.b32.xlu1 %v783_v35, %s1504_s19 }
 0x2ea   : > { %879 = vrot.lane.b32.xlu0 %v785_v37, %s1504_s19  ;;  %873 = vrot.lane.b32.xlu1 %v776_v27, %s1504_s19 }
 0x2ee   : > { %797 = vperm.xlu0 %1474, %v789_v23   ;;  %792 = vperm.xlu1 %1473, %v788_v38   ;;  %v882_v38 = vsel %vm522_vm9, %v1924_v40, %v1922_v39 }
 0x31c   : > { %v866_v47 = vpop.permute.xlu1 %865  ;;  %v848_v48 = vpop.permute.xlu0 %847 }
 0x320   : > { %v858_v49 = vpop.permute.xlu1 %857  ;;  %v840_v50 = vpop.permute.xlu0 %839 }
 0x324   : > { %v850_v51 = vpop.permute.xlu1 %849  ;;  %v832_v52 = vpop.permute.xlu0 %831 }
 0x328   : > { %v842_v53 = vpop.permute.xlu1 %841  ;;  %v1926_v54 = vpop.permute.xlu0 %823 }
 0x32c   : > { %v834_v55 = vpop.permute.xlu1 %833  ;;  %v872_v56 = vpop.permute.xlu0 %871 }
 0x330   : > { %v826_v57 = vpop.permute.xlu1 %825  ;;  %v864_v58 = vpop.permute.xlu0 %863 }
 0x334   : > { %v818_v59 = vpop.permute.xlu1 %817  ;;  %v856_v60 = vpop.permute.xlu0 %855 }
 0x338   : > { %v868_v61 = vpop.permute.xlu1 %867  ;;  %v870_v62 = vpop.permute.xlu0 %869 }
 0x339   : > { %v902_v1 = vsel %vm522_vm9, %v866_v47, %v868_v61  ;;  %v904_v63 = vsel %vm522_vm9, %v870_v62, %v872_v56  ;;  %v903_v2 = vsel %vm522_vm9, %v868_v61, %v870_v62 }
 0x33a   : > { %938 = vmatprep.subr.bf16.mxu0 %v903_v2  ;;  %982 = vmatpush1.bf16.msra.mxu1 %v904_v63 }
 0x33b   : > { %939 = vmatpush1.bf16.msra.mxu0 %v902_v1  ;;  %983 = vmatprep.subr.bf16.mxu1 %v1505_v33 }
 0x33c   : > { %v860_v3 = vpop.permute.xlu1 %859  ;;  %v862_v4 = vpop.permute.xlu0 %861 }
 0x33d   : > { %v899_v5 = vsel %vm522_vm9, %v858_v49, %v860_v3  ;;  %v901_v6 = vsel %vm522_vm9, %v862_v4, %v864_v58  ;;  %v900_v7 = vsel %vm522_vm9, %v860_v3, %v862_v4 }
 0x33e   : > { %940 = vmatprep.subr.bf16.mxu0 %v900_v7  ;;  %984 = vmatpush1.bf16.msra.mxu1 %v901_v6 }
 0x33f   : > { %941 = vmatpush1.bf16.msra.mxu0 %v899_v5  ;;  %985 = vmatprep.subr.bf16.mxu1 %v1505_v33 }
 0x340   : > { %v852_v9 = vpop.permute.xlu1 %851  ;;  %v854_v10 = vpop.permute.xlu0 %853 }
 0x341   : > { %v896_v11 = vsel %vm522_vm9, %v850_v51, %v852_v9  ;;  %v898_v13 = vsel %vm522_vm9, %v854_v10, %v856_v60  ;;  %v897_v14 = vsel %vm522_vm9, %v852_v9, %v854_v10 }
 0x342   : > { %942 = vmatprep.subr.bf16.mxu0 %v897_v14  ;;  %986 = vmatpush1.bf16.msra.mxu1 %v898_v13 }
 0x343   : > { %943 = vmatpush1.bf16.msra.mxu0 %v896_v11  ;;  %987 = vmatprep.subr.bf16.mxu1 %v1505_v33 }
 0x344   : > { %v844_v15 = vpop.permute.xlu1 %843  ;;  %v846_v16 = vpop.permute.xlu0 %845 }
 0x345   : > { %v893_v17 = vsel %vm522_vm9, %v842_v53, %v844_v15  ;;  %v895_v18 = vsel %vm522_vm9, %v846_v16, %v848_v48  ;;  %v894_v19 = vsel %vm522_vm9, %v844_v15, %v846_v16 }
 0x346   : > { %944 = vmatprep.subr.bf16.mxu0 %v894_v19  ;;  %988 = vmatpush1.bf16.msra.mxu1 %v895_v18 }
 0x347   : > { %945 = vmatpush1.bf16.msra.mxu0 %v893_v17  ;;  %989 = vmatprep.subr.bf16.mxu1 %v1505_v33 }
 0x348   : > { %v836_v20 = vpop.permute.xlu1 %835  ;;  %v838_v21 = vpop.permute.xlu0 %837 }
 0x349   : > { %v890_v22 = vsel %vm522_vm9, %v834_v55, %v836_v20  ;;  %v892_v25 = vsel %vm522_vm9, %v838_v21, %v840_v50  ;;  %v891_v26 = vsel %vm522_vm9, %v836_v20, %v838_v21 }
 0x34a   : > { %946 = vmatprep.subr.bf16.mxu0 %v891_v26  ;;  %990 = vmatpush1.bf16.msra.mxu1 %v892_v25 }
 0x34b   : > { %947 = vmatpush1.bf16.msra.mxu0 %v890_v22  ;;  %991 = vmatprep.subr.bf16.mxu1 %v1505_v33 }
 0x34c   : > { %v828_v27 = vpop.permute.xlu1 %827  ;;  %v830_v28 = vpop.permute.xlu0 %829 }
 0x34d   : > { %v887_v29 = vsel %vm522_vm9, %v826_v57, %v828_v27  ;;  %v889_v30 = vsel %vm522_vm9, %v830_v28, %v832_v52  ;;  %v888_v31 = vsel %vm522_vm9, %v828_v27, %v830_v28 }
 0x34e   : > { %948 = vmatprep.subr.bf16.mxu0 %v888_v31  ;;  %992 = vmatpush1.bf16.msra.mxu1 %v889_v30 }
 0x34f   : > { %949 = vmatpush1.bf16.msra.mxu0 %v887_v29  ;;  %993 = vmatprep.subr.bf16.mxu1 %v1505_v33 }
 0x350   : > { %v820_v32 = vpop.permute.xlu1 %819  ;;  %v822_v34 = vpop.permute.xlu0 %821 }
 0x351   : > { %v884_v35 = vsel %vm522_vm9, %v818_v59, %v820_v32  ;;  %v886_v37 = vsel %vm522_vm9, %v822_v34, %v1926_v54  ;;  %v885_v23 = vsel %vm522_vm9, %v820_v32, %v822_v34 }
 0x352   : > { %950 = vmatprep.subr.bf16.mxu0 %v885_v23  ;;  %994 = vmatpush1.bf16.msra.mxu1 %v886_v37 }
 0x353   : > { %951 = vmatpush1.bf16.msra.mxu0 %v884_v35  ;;  %995 = vmatprep.subr.bf16.mxu1 %v1505_v33 }
 0x354   : > { %v1960_v47 = vpop.permute.xlu1 %809  ;;  %952 = vmatprep.subr.bf16.mxu0 %v882_v38  ;;  %v816_v48 = vpop.permute.xlu0 %815 }
 0x355   : > { %v881_v49 = vsel %vm522_vm9, %v1960_v47, %v1924_v40  ;;  %v883_v50 = vsel %vm522_vm9, %v1922_v39, %v816_v48  ;;  %v1487_v40 = vld [vmem:[%s2160_s4] ss:$8 sps:$4 sm:$0xff]  }
 0x356   : > { %996 = vmatpush1.bf16.msra.mxu1 %v883_v50 }
 0x357   : > { %953 = vmatpush1.bf16.msra.mxu0 %v881_v49  ;;  %1011 = vmatprep.subr.bf16.mxu1 %v1505_v33 }
 0x358   : > { %v876_v51 = vpop.permute.xlu1 %875  ;;  %v878_v52 = vpop.permute.xlu0 %877 }
 0x359   : > { %v906_v53 = vsel %vm522_vm9, %v876_v51, %v878_v52 }
 0x35a   : > { %968 = vmatprep.subr.bf16.mxu0 %v906_v53 }
 0x35c   : > { %v874_v54 = vpop.permute.xlu1 %873  ;;  %v880_v55 = vpop.permute.xlu0 %879 }
 0x35d   : > { %v905_v56 = vsel %vm522_vm9, %v874_v54, %v876_v51  ;;  %v907_v57 = vsel %vm522_vm9, %v878_v52, %v880_v55 }
 0x35e   : > { %969 = vmatpush2.bf16.msra.mxu0 %v905_v56  ;;  %1012 = vmatpush2.bf16.msra.mxu1 %v907_v57 }
 0x35f   : > { %1310 = vmatprep.subr.bf16.mxu1 %v1505_v33 }
 0x361   : > { %971 = vmatmul.mubr.bf16.vlgmr.msra.gmra.mxu0 %v1487_v40  ;;  %1014 = vmatmul.mubr.bf16.vlgmr.msra.gmra.mxu1 %v1487_v40 }
 0x369   : > { %v793_v59 = vpop.permute.xlu1 %792  ;;  %v798_v63 = vpop.permute.xlu0 %797 }
 0x421   : > { %v972_v39 = vpop.f32.mrf.mxu0  ;;  %v1015_v58 = vpop.f32.mrf.mxu1 }
 0x422   : > { %v1016_v60 = vadd.f32 %v1015_v58, %v793_v59  ;;  %v973_v9 = vadd.f32 %v972_v39, %v793_v59 }
 0x423   : > { %v974_v61 = vpop.f32.mrf.mxu0  ;;  %v1017_v62 = vpop.f32.mrf.mxu1 }
 0x424   : > { %v1024_v3 = vmax.f32 %v1016_v60, 0.0  ;;  %v1022_v15 = vmax.f32 %v973_v9, 0.0  ;;  %v975_v20 = vadd.f32 %v974_v61, %v793_v59 }
 0x425   : > { %v1018_v1 = vpop.f32.mrf.mxu1  ;;  %v976_v2 = vpop.f32.mrf.mxu0 }
 0x426   : > { %v1019_v4 = vadd.f32 %v1018_v1, %v798_v63  ;;  %v977_v6 = vadd.f32 %v976_v2, %v798_v63  ;;  %v1030_v10 = vmul.f32 %v1024_v3, %v1775_v12  ;;  %v1028_v18 = vmul.f32 %v1022_v15, %v1786_v24 }
 0x427   : > { %v1020_v5 = vpop.f32.mrf.mxu1  ;;  %v978_v17 = vpop.f32.mrf.mxu0  ;;  %v1023_v22 = vmax.f32 %v975_v20, 0.0  ;;  %v1112_v20 = vld [vmem:[%s2163_s7] sm:$0x3] }
 0x428   : > { %v1027_v7 = vmax.f32 %v1019_v4, 0.0  ;;  %v1025_v13 = vmax.f32 %v977_v6, 0.0  ;;  %v979_v19 = vadd.f32 %v978_v17, %v798_v63  ;;  %v1506_v6 = vmov 1966171168  }
 0x429   : > { %v1029_v25 = vmul.f32 %v1023_v22, %v1804_v36 }
 0x42a   : > { %v1033_v11 = vmul.f32 %v1027_v7, %v1775_v12  ;;  %v1031_v16 = vmul.f32 %v1025_v13, %v1786_v24  ;;  %v1026_v21 = vmax.f32 %v979_v19, 0.0  ;;  %v1128_v7 = vunpack.c.l.s4 %v1506_v6 }
 0x42c   : > { %v1977_v14 = vpack.c.bf16 %v1033_v11, %v1030_v10  ;;  %v1034_v12 = vpack.c.bf16 %v1031_v16, %v1028_v18  ;;  %v1032_v24 = vmul.f32 %v1026_v21, %v1804_v36  ;;  %v1129_v9 = vunpack.c.0.s8 %v1128_v7  ;;  %v1446_v11 = vld.sshfl [vmem:[%s2162_s6] sm:$0x11 pattern:$0x75316420] }
 0x42d   : > { %v1126_v13 = vcombine.high %v1446_v11, %v1446_v11 }
 0x42e   : > { %1088 = vrot.lane.b32.xlu0 %v1977_v14, %s1497_s12  ;;  %1097 = vrot.lane.b32.xlu1 %v1977_v14, %s1496_s11  ;;  %v1998_v26 = vpack.c.bf16 %v1032_v24, %v1029_v25  ;;  %v1132_v15 = vsub.s32 %v1129_v9, %v1769_v0 }
 0x430   : > { %v1140_v17 = vrot.slane %v1126_v13, %v1132_v15 }
 0x432   : > { %1071 = vrot.lane.b32.xlu0 %v1977_v14, %s1499_s14  ;;  %1079 = vrot.lane.b32.xlu1 %v1977_v14, %s1498_s13 }
 0x433   : > { %1447 = vmatprep.mubr.msk.bf16.mxu0 %vm577_vm8, %v1140_v17  ;;  %1448 = vmatprep.mubr.msk.bf16.mxu1 %vm577_vm8, %v1140_v17 }
 0x436   : > { %1062 = vrot.lane.b32.xlu1 %v1977_v14, %s1500_s15  ;;  %1084 = vrot.lane.b32.xlu0 %v1034_v12, %s1497_s12 }
 0x43a   : > { %1067 = vrot.lane.b32.xlu0 %v1034_v12, %s1499_s14  ;;  %1093 = vrot.lane.b32.xlu1 %v1034_v12, %s1496_s11 }
 0x43e   : > { %1049 = vrot.lane.b32.xlu0 %v1034_v12, %s1501_s16  ;;  %1075 = vrot.lane.b32.xlu1 %v1034_v12, %s1498_s13 }
 0x442   : > { %1095 = vrot.lane.b32.xlu0 %v1998_v26, %s1496_s11  ;;  %1058 = vrot.lane.b32.xlu1 %v1034_v12, %s1500_s15 }
 0x446   : > { %1053 = vrot.lane.b32.xlu0 %v1977_v14, %s1501_s16  ;;  %1086 = vrot.lane.b32.xlu1 %v1998_v26, %s1497_s12 }
 0x44a   : > { %1077 = vrot.lane.b32.xlu0 %v1998_v26, %s1498_s13  ;;  %1040 = vrot.lane.b32.xlu1 %v1034_v12, %s1502_s17 }
 0x44e   : > { %1102 = vrot.lane.b32.xlu0 %v1034_v12, %s1503_s18  ;;  %1069 = vrot.lane.b32.xlu1 %v1998_v26, %s1499_s14 }
 0x452   : > { %1060 = vrot.lane.b32.xlu0 %v1998_v26, %s1500_s15  ;;  %1044 = vrot.lane.b32.xlu1 %v1977_v14, %s1502_s17  ;;  %s1452_s15 = smul.u32 6, %s2166_s28 }
 0x456   : > { %1106 = vrot.lane.b32.xlu0 %v1977_v14, %s1503_s18  ;;  %1051 = vrot.lane.b32.xlu1 %v1998_v26, %s1501_s16 }
 0x45a   : > { %1042 = vrot.lane.b32.xlu0 %v1998_v26, %s1502_s17  ;;  %1104 = vrot.lane.b32.xlu1 %v1998_v26, %s1503_s18  ;;  %s305_s18 = scalar_lea.vmem %s2164_s8, %s1452_s15 }
 0x45e   : > { %1142 = vrot.lane.b32.xlu0 %v1034_v12, %s1504_s19  ;;  %v2083_v12 = vrot.slane %v1446_v11, %v1132_v15 }
 0x4a0   : > { %v1089_v36 = vpop.permute.xlu0 %1088  ;;  %v1098_v27 = vpop.permute.xlu1 %1097 }
 0x4a1   : > { %v1101_v53 = vsel %vm411_vm0, %v1098_v27, %v1827_v41  ;;  %v1092_v55 = vsel %vm399_vm1, %v1089_v36, %v1831_v43 }
 0x4a4   : > { %v1072_v28 = vpop.permute.xlu0 %1071  ;;  %v1080_v29 = vpop.permute.xlu1 %1079 }
 0x4a5   : > { %1178 = vrot.lane.b32.xlu1 %v1072_v28, %s1504_s19  ;;  %v1083_v41 = vsel %vm387_vm2, %v1080_v29, %v1835_v45 }
 0x4a8   : > { %v1063_v30 = vpop.permute.xlu1 %1062  ;;  %v1085_v31 = vpop.permute.xlu0 %1084 }
 0x4a9   : > { %1188 = vrot.lane.b32.xlu0 %v1085_v31, %s1504_s19  ;;  %1170 = vrot.lane.b32.xlu1 %v1063_v30, %s1504_s19 }
 0x4ac   : > { %v1068_v32 = vpop.permute.xlu0 %1067  ;;  %v1094_v34 = vpop.permute.xlu1 %1093 }
 0x4b0   : > { %v1050_v35 = vpop.permute.xlu0 %1049  ;;  %v1076_v37 = vpop.permute.xlu1 %1075 }
 0x4b1   : > { %1180 = vrot.lane.b32.xlu0 %v1076_v37, %s1504_s19  ;;  %v1055_v51 = vsel %vm349_vm5, %v1833_v44, %v1050_v35 }
 0x4b4   : > { %v1096_v23 = vpop.permute.xlu0 %1095  ;;  %v1059_v38 = vpop.permute.xlu1 %1058 }
 0x4b5   : > { %1172 = vrot.lane.b32.xlu0 %v1068_v32, %s1504_s19  ;;  %v1064_v48 = vsel %vm361_vm4, %v1829_v42, %v1059_v38  ;;  %v1100_v44 = vsel %vm411_vm0, %v1096_v23, %v1098_v27  ;;  %v1099_v40 = vsel %vm411_vm0, %v1094_v34, %v1096_v23 }
 0x4b8   : > { %v1054_v49 = vpop.permute.xlu0 %1053  ;;  %v1087_v50 = vpop.permute.xlu1 %1086 }
 0x4b9   : > { %1162 = vrot.lane.b32.xlu1 %v1054_v49, %s1504_s19  ;;  %1164 = vrot.lane.b32.xlu0 %v1064_v48, %s1504_s19  ;;  %v1090_v56 = vsel %vm399_vm1, %v1085_v31, %v1087_v50  ;;  %v1091_v58 = vsel %vm399_vm1, %v1087_v50, %v1089_v36 }
 0x4bc   : > { %v1041_v52 = vpop.permute.xlu1 %1040  ;;  %v1078_v54 = vpop.permute.xlu0 %1077 }
 0x4bd   : > { %1196 = vrot.lane.b32.xlu1 %v1094_v34, %s1504_s19  ;;  %1156 = vrot.lane.b32.xlu0 %v1055_v51, %s1504_s19  ;;  %v1046_v42 = vsel %vm337_vm6, %v1837_v46, %v1041_v52  ;;  %v1081_v43 = vsel %vm387_vm2, %v1076_v37, %v1078_v54  ;;  %v1082_v60 = vsel %vm387_vm2, %v1078_v54, %v1080_v29 }
 0x4c0   : > { %v1103_v46 = vpop.permute.xlu0 %1102  ;;  %v1070_v57 = vpop.permute.xlu1 %1069 }
 0x4c1   : > { %1202 = vrot.lane.b32.xlu1 %v1101_v53, %s1504_s19  ;;  %1148 = vrot.lane.b32.xlu0 %v1046_v42, %s1504_s19  ;;  %v1073_v59 = vsel %vm371_vm3, %v1068_v32, %v1070_v57  ;;  %v1074_v63 = vsel %vm371_vm3, %v1070_v57, %v1072_v28 }
 0x4c4   : > { %v1061_v39 = vpop.permute.xlu0 %1060  ;;  %v1045_v45 = vpop.permute.xlu1 %1044 }
 0x4c5   : > { %1194 = vrot.lane.b32.xlu1 %v1092_v55, %s1504_s19  ;;  %1200 = vrot.lane.b32.xlu0 %v1100_v44, %s1504_s19  ;;  %v1065_v62 = vsel %vm361_vm4, %v1059_v38, %v1061_v39  ;;  %v1066_v4 = vsel %vm361_vm4, %v1061_v39, %v1063_v30 }
 0x4c8   : > { %v1107_v61 = vpop.permute.xlu0 %1106  ;;  %v1052_v1 = vpop.permute.xlu1 %1051 }
 0x4c9   : > { %1186 = vrot.lane.b32.xlu1 %v1083_v41, %s1504_s19  ;;  %1190 = vrot.lane.b32.xlu0 %v1090_v56, %s1504_s19  ;;  %v1056_v2 = vsel %vm349_vm5, %v1050_v35, %v1052_v1  ;;  %v1057_v10 = vsel %vm349_vm5, %v1052_v1, %v1054_v49  ;;  %v1110_v22 = vsel %vm423_vm7, %v1107_v61, %v1872_v8 }
 0x4cc   : > { %v1043_v3 = vpop.permute.xlu0 %1042  ;;  %v1105_v16 = vpop.permute.xlu1 %1104 }
 0x4cd   : > { %1198 = vrot.lane.b32.xlu1 %v1099_v40, %s1504_s19  ;;  %1182 = vrot.lane.b32.xlu0 %v1081_v43, %s1504_s19  ;;  %v1047_v5 = vsel %vm337_vm6, %v1041_v52, %v1043_v3  ;;  %v1048_v18 = vsel %vm337_vm6, %v1043_v3, %v1045_v45  ;;  %v1109_v19 = vsel %vm423_vm7, %v1105_v16, %v1107_v61 }
 0x4ce   : > { %v1108_v21 = vsel %vm423_vm7, %v1103_v46, %v1105_v16 }
 0x4d0   : > { %v2103_v24 = vpop.permute.xlu0 %1142 }
 0x4d1   : > { %1192 = vrot.lane.b32.xlu1 %v1091_v58, %s1504_s19  ;;  %1174 = vrot.lane.b32.xlu0 %v1073_v59, %s1504_s19  ;;  %v1212_v16 = vsel %vm522_vm9, %v1960_v47, %v2103_v24 }
 0x4d5   : > { %1184 = vrot.lane.b32.xlu1 %v1082_v60, %s1504_s19  ;;  %1166 = vrot.lane.b32.xlu0 %v1065_v62, %s1504_s19 }
 0x4d9   : > { %1176 = vrot.lane.b32.xlu1 %v1074_v63, %s1504_s19  ;;  %1158 = vrot.lane.b32.xlu0 %v1056_v2, %s1504_s19 }
 0x4dd   : > { %1168 = vrot.lane.b32.xlu1 %v1066_v4, %s1504_s19  ;;  %1150 = vrot.lane.b32.xlu0 %v1047_v5, %s1504_s19 }
 0x4e1   : > { %1160 = vrot.lane.b32.xlu1 %v1057_v10, %s1504_s19  ;;  %1154 = vrot.lane.b32.xlu0 %v1045_v45, %s1504_s19 }
 0x4e5   : > { %1152 = vrot.lane.b32.xlu1 %v1048_v18, %s1504_s19  ;;  %1208 = vrot.lane.b32.xlu0 %v1109_v19, %s1504_s19 }
 0x4e9   : > { %1144 = vrot.lane.b32.xlu1 %v1998_v26, %s1504_s19  ;;  %1204 = vrot.lane.b32.xlu0 %v1103_v46, %s1504_s19 }
 0x4ed   : > { %1206 = vrot.lane.b32.xlu1 %v1108_v21, %s1504_s19  ;;  %1115 = vperm.xlu0 %1474, %v1112_v20  }
 0x4f1   : > { %1146 = vrot.lane.b32.xlu1 %v1977_v14, %s1504_s19 }
 0x4f5   : > { %1210 = vrot.lane.b32.xlu1 %v1110_v22, %s1504_s19 }
 0x517   : > { %v1179_v26 = vpop.permute.xlu1 %1178 }
 0x51b   : > { %v1189_v25 = vpop.permute.xlu0 %1188  ;;  %v1171_v27 = vpop.permute.xlu1 %1170 }
 0x523   : > { %v1181_v36 = vpop.permute.xlu0 %1180 }
 0x527   : > { %v1173_v28 = vpop.permute.xlu0 %1172 }
 0x52b   : > { %v1165_v29 = vpop.permute.xlu0 %1164  ;;  %v1163_v30 = vpop.permute.xlu1 %1162 }
 0x52f   : > { %v1157_v31 = vpop.permute.xlu0 %1156  ;;  %v1197_v32 = vpop.permute.xlu1 %1196 }
 0x533   : > { %v2105_v34 = vpop.permute.xlu0 %1148  ;;  %v1203_v35 = vpop.permute.xlu1 %1202 }
 0x537   : > { %v1201_v14 = vpop.permute.xlu0 %1200  ;;  %v1195_v37 = vpop.permute.xlu1 %1194 }
 0x538   : > { %v1235_v8 = vsel %vm522_vm9, %v1201_v14, %v1203_v35 }
 0x539   : > { %1311 = vmatpush1.bf16.msra.mxu1 %v1235_v8 }
 0x53a   : > { %1312 = vmatprep.subr.bf16.mxu1 %v1505_v33 }
 0x53b   : > { %v1191_v23 = vpop.permute.xlu0 %1190  ;;  %v1187_v38 = vpop.permute.xlu1 %1186 }
 0x53c   : > { %v1230_v55 = vsel %vm522_vm9, %v1189_v25, %v1191_v23 }
 0x53f   : > { %v1199_v48 = vpop.permute.xlu1 %1198  ;;  %v1183_v49 = vpop.permute.xlu0 %1182 }
 0x540   : > { %v1233_v50 = vsel %vm522_vm9, %v1197_v32, %v1199_v48  ;;  %v1234_v51 = vsel %vm522_vm9, %v1199_v48, %v1201_v14  ;;  %v1227_v57 = vsel %vm522_vm9, %v1181_v36, %v1183_v49 }
 0x541   : > { %1269 = vmatprep.subr.bf16.mxu0 %v1234_v51 }
 0x542   : > { %1270 = vmatpush1.bf16.msra.mxu0 %v1233_v50 }
 0x543   : > { %v1193_v52 = vpop.permute.xlu1 %1192  ;;  %v1175_v53 = vpop.permute.xlu0 %1174 }
 0x544   : > { %v1232_v42 = vsel %vm522_vm9, %v1193_v52, %v1195_v37  ;;  %v1231_v54 = vsel %vm522_vm9, %v1191_v23, %v1193_v52  ;;  %v1224_v45 = vsel %vm522_vm9, %v1173_v28, %v1175_v53 }
 0x545   : > { %1271 = vmatprep.subr.bf16.mxu0 %v1231_v54  ;;  %1313 = vmatpush1.bf16.msra.mxu1 %v1232_v42 }
 0x546   : > { %1272 = vmatpush1.bf16.msra.mxu0 %v1230_v55  ;;  %1314 = vmatprep.subr.bf16.mxu1 %v1505_v33 }
 0x547   : > { %v1185_v44 = vpop.permute.xlu1 %1184  ;;  %v1167_v41 = vpop.permute.xlu0 %1166 }
 0x548   : > { %v1229_v56 = vsel %vm522_vm9, %v1185_v44, %v1187_v38  ;;  %v1228_v46 = vsel %vm522_vm9, %v1183_v49, %v1185_v44  ;;  %v1221_v1 = vsel %vm522_vm9, %v1165_v29, %v1167_v41 }
 0x549   : > { %1273 = vmatprep.subr.bf16.mxu0 %v1228_v46  ;;  %1315 = vmatpush1.bf16.msra.mxu1 %v1229_v56 }
 0x54a   : > { %1274 = vmatpush1.bf16.msra.mxu0 %v1227_v57  ;;  %1316 = vmatprep.subr.bf16.mxu1 %v1505_v33 }
 0x54b   : > { %v1177_v40 = vpop.permute.xlu1 %1176  ;;  %v1159_v43 = vpop.permute.xlu0 %1158 }
 0x54c   : > { %v1226_v39 = vsel %vm522_vm9, %v1177_v40, %v1179_v26  ;;  %v1225_v58 = vsel %vm522_vm9, %v1175_v53, %v1177_v40  ;;  %v1218_v5 = vsel %vm522_vm9, %v1157_v31, %v1159_v43 }
 0x54d   : > { %1275 = vmatprep.subr.bf16.mxu0 %v1225_v58  ;;  %1317 = vmatpush1.bf16.msra.mxu1 %v1226_v39 }
 0x54e   : > { %1276 = vmatpush1.bf16.msra.mxu0 %v1224_v45  ;;  %1318 = vmatprep.subr.bf16.mxu1 %v1505_v33 }
 0x54f   : > { %v1169_v59 = vpop.permute.xlu1 %1168  ;;  %v1151_v60 = vpop.permute.xlu0 %1150 }
 0x550   : > { %v1223_v61 = vsel %vm522_vm9, %v1169_v59, %v1171_v27  ;;  %v1222_v62 = vsel %vm522_vm9, %v1167_v41, %v1169_v59  ;;  %v1215_v10 = vsel %vm522_vm9, %v2105_v34, %v1151_v60 }
 0x551   : > { %1277 = vmatprep.subr.bf16.mxu0 %v1222_v62  ;;  %1319 = vmatpush1.bf16.msra.mxu1 %v1223_v61 }
 0x552   : > { %1278 = vmatpush1.bf16.msra.mxu0 %v1221_v1  ;;  %1320 = vmatprep.subr.bf16.mxu1 %v1505_v33 }
 0x553   : > { %v1161_v63 = vpop.permute.xlu1 %1160  ;;  %v1155_v2 = vpop.permute.xlu0 %1154 }
 0x554   : > { %v1220_v3 = vsel %vm522_vm9, %v1161_v63, %v1163_v30  ;;  %v1219_v4 = vsel %vm522_vm9, %v1159_v43, %v1161_v63 }
 0x555   : > { %1279 = vmatprep.subr.bf16.mxu0 %v1219_v4  ;;  %1321 = vmatpush1.bf16.msra.mxu1 %v1220_v3 }
 0x556   : > { %1280 = vmatpush1.bf16.msra.mxu0 %v1218_v5  ;;  %1322 = vmatprep.subr.bf16.mxu1 %v1505_v33 }
 0x557   : > { %v1153_v6 = vpop.permute.xlu1 %1152  ;;  %v1209_v11 = vpop.permute.xlu0 %1208 }
 0x558   : > { %v1217_v7 = vsel %vm522_vm9, %v1153_v6, %v1155_v2  ;;  %v1216_v9 = vsel %vm522_vm9, %v1151_v60, %v1153_v6 }
 0x559   : > { %1281 = vmatprep.subr.bf16.mxu0 %v1216_v9  ;;  %1323 = vmatpush1.bf16.msra.mxu1 %v1217_v7 }
 0x55a   : > { %1282 = vmatpush1.bf16.msra.mxu0 %v1215_v10  ;;  %1324 = vmatprep.subr.bf16.mxu1 %v1505_v33 }
 0x55b   : > { %v1145_v13 = vpop.permute.xlu1 %1144  ;;  %v1205_v17 = vpop.permute.xlu0 %1204 }
 0x55c   : > { %v1213_v15 = vsel %vm522_vm9, %v2103_v24, %v1145_v13  ;;  %v1507_v24 = vmov 1983009808  }
 0x55d   : > { %1283 = vmatprep.subr.bf16.mxu0 %v1213_v15  ;;  %v1355_v26 = vunpack.c.l.s4 %v1507_v24 }
 0x55e   : > { %1284 = vmatpush1.bf16.msra.mxu0 %v1212_v16 }
 0x55f   : > { %v1207_v18 = vpop.permute.xlu1 %1206  ;;  %v1356_v29 = vunpack.c.0.s8 %v1355_v26 }
 0x560   : > { %v1236_v19 = vsel %vm522_vm9, %v1205_v17, %v1207_v18  ;;  %v1237_v20 = vsel %vm522_vm9, %v1207_v18, %v1209_v11 }
 0x561   : > { %1299 = vmatprep.subr.bf16.mxu0 %v1237_v20  ;;  %v1359_v35 = vsub.s32 %v1356_v29, %v1769_v0 }
 0x562   : > { %1300 = vmatpush2.bf16.msra.mxu0 %v1236_v19 }
 0x563   : > { %v1147_v21 = vpop.permute.xlu1 %1146 }
 0x564   : > { %v1214_v22 = vsel %vm522_vm9, %v1145_v13, %v1147_v21 }
 0x565   : > { %1302 = vmatmul.mubr.bf16.vlgmr.msra.gmra.mxu0 %v2083_v12  ;;  %1325 = vmatpush1.bf16.msra.mxu1 %v1214_v22 }
 0x566   : > { %1340 = vmatprep.subr.bf16.mxu1 %v1505_v33 }
 0x567   : > { %v1211_v25 = vpop.permute.xlu1 %1210 }
 0x568   : > { %v1238_v47 = vsel %vm522_vm9, %v1209_v11, %v1211_v25  ;;  %v1116_v27 = vpop.permute.xlu0 %1115 }
 0x569   : > { %1341 = vmatpush2.bf16.msra.mxu1 %v1238_v47 }
 0x56c   : > { %1343 = vmatmul.mubr.bf16.vlgmr.msra.gmra.mxu1 %v2083_v12 }
 0x625   : > { %v1303_v36 = vpop.f32.mrf.mxu0 }
 0x626   : > { %v1304_v31 = vadd.f32 %v1303_v36, %v1116_v27 }
 0x627   : > { %v1305_v28 = vpop.f32.mrf.mxu0 }
 0x628   : > { %v1306_v30 = vadd.f32 %v1305_v28, %v1116_v27 }
 0x629   : > { %v1307_v32 = vpop.f32.mrf.mxu0 }
 0x62a   : > { %v1353_v34 = vcombine.low %v1304_v31, %v1306_v30 }
 0x62b   : > { %v1308_v33 = vpop.f32.mrf.mxu0 }
 0x62c   : > { %v1344_v14 = vpop.f32.mrf.mxu1  ;;  %v1360_v23 = vrot.slane %v1353_v34, %v1359_v35 }
 0x62d   : > { %v1345_v37 = vadd.f32 %v1344_v14, %v1116_v27 }
 0x62e   : > { %v1346_v8 = vpop.f32.mrf.mxu1 }
 0x62f   : > { %v1367_v38 = vrot.slane %v1345_v37, %v1359_v35 }
 0x630   : > { %v1347_v12 = vpop.f32.mrf.mxu1 }
 0x631   : > { %v1368_v48 = vcombine.low %v1360_v23, %v1367_v38 }
 0x632   : > { %v1348_v49 = vpop.f32.mrf.mxu1 }
 0x633   : > { %1370 = vst [vmem:[%s305_s18] sm:$0x3f] %v1368_v48 }
 0x634 PF: > { %s18_s27 = sadd.s32 1, %s1494_s27  }
 0x635   : > { %p15_p4 = scmp.ge.s32.totalorder %s18_s27, 4  }
 0x637   :  { %17 = sbr.rel (!%p15_p4) target bundleno = 1 (0x1), region = 82 }

</bundles_post_ra>
